<compile_context>
chip_gen: v7x
topology: tpu7x:2x2x1
jax: 0.10.0
libtpu: 0.0.40
codegen_flags: <defaults>
</compile_context>

<pallas_src>
import functools

import jax
import jax.numpy as jnp
from jax.experimental import pallas as pl
from jax.experimental.pallas import tpu as pltpu


_KPAD = 16       # raw 6-d point/settings features zero-padded to 16 inputs
_OUT_COLS = 128  # final matmul width (one lane group); store slices [:, :6]


def _round_up(x, m):
    return ((x + m - 1) // m) * m


# ----------------------------------------------------------------------------
# Kernel
# ----------------------------------------------------------------------------
def _ebpn_kernel(x_ref, s_ref, w_ref, b_ref, o_ref, *,
                 tb, npts, hidden, p2, p4, out_dim, woff, brow, act_dtype):
    f32 = jnp.float32
    bf16 = jnp.bfloat16
    H = hidden
    twoH = 2 * H
    R = tb * npts

    def W(name, rows, cols):
        r0 = woff[name]
        return w_ref[r0:r0 + rows, 0:cols]          # static, tile-aligned view

    def B(name, cols):
        i = brow[name]
        return b_ref[i:i + 1, 0:cols]                # (1, cols) f32, broadcasts

    def mm(a, w):
        # bf16 operands, f32 accumulation on the MXU.
        return jnp.dot(a.astype(bf16), w, preferred_element_type=f32)

    def act(v):
        # ReLU, then cast the carried activation (bf16 on v6e/v7x, f32 on v5e).
        return jnp.maximum(v, 0.0).astype(act_dtype)

    x = x_ref[...]                                   # (R, KPAD) bf16, cols 6.. are 0

    # ---- residual block 1 (6 -> H); fc1 + shortcut fused in one matmul ----
    h0 = mm(x, W("w1ab", _KPAD, twoH)) + B("b1ab", twoH)   # (R, 2H) f32
    h = act(h0[:, :H])
    identity = h0[:, H:]
    x1 = act(mm(h, W("w1b", H, H)) + B("b1b", H) + identity)

    # ---- residual block 2 (identity shortcut) ----
    h = act(mm(x1, W("w2a", H, H)) + B("b2a", H))
    x2 = act(mm(h, W("w2b", H, H)) + B("b2b", H) + x1)

    # ---- residual block 3 ----
    h = act(mm(x2, W("w3a", H, H)) + B("b3a", H))
    x3 = act(mm(h, W("w3b", H, H)) + B("b3b", H) + x2)      # (R, H)

    # ---- per-sample max pool over points -> (tb, H) ----
    if tb == 1:
        xg = jnp.max(x3, axis=0, keepdims=True)
    else:
        xg = jnp.max(x3.reshape(tb, npts, H), axis=1)

    # ---- global MLP; concat([xg, settings]) done as split matmuls ----
    s = s_ref[0]                                            # (tb, KPAD) bf16
    g1 = act(mm(xg, W("wg1x", H, twoH))
             + mm(s, W("wg1s", _KPAD, twoH)) + B("bg1", twoH))
    g2 = act(mm(g1, W("wg2", twoH, H)) + B("bg2", H))       # (tb, H)

    # ---- mlp4 on concat([x3, global]) == split matmuls ----
    gpt = mm(g2, W("wm41g", H, H))                          # (tb, H) f32
    if tb == 1:
        gb = jnp.broadcast_to(gpt, (R, H))
    else:
        gb = jnp.broadcast_to(gpt[:, None, :], (tb, npts, H)).reshape(R, H)
    m1 = act(mm(x3, W("wm41x", H, H)) + gb + B("bm41", H))
    m2 = act(mm(m1, W("wm42", H, p2)) + B("bm42", p2))      # (R, p2); padded tail stays 0
    m3 = act(mm(m2, W("wm51", p2, p4)) + B("bm51", p4))     # (R, p4)

    out = mm(m3, W("wm52", p4, _OUT_COLS)) + B("bm52", _OUT_COLS)  # (R, 128) f32
    o_ref[...] = out[:, :out_dim].astype(o_ref.dtype)       # masked 6-lane store


# ----------------------------------------------------------------------------
# Host-side weight/bias packing into two slabs
# ----------------------------------------------------------------------------
def _pack_params(params, H):
    f32 = jnp.float32
    twoH = 2 * H
    P2 = _round_up(max(H // 2, 8), 128)
    P4 = _round_up(max(H // 4, 8), 128)
    SW = max(twoH, 128, P2, P4, _OUT_COLS)          # slab width (lanes)

    w1ab = jnp.concatenate([params["w1a"], params["w1s"]], axis=1)   # (6, 2H)
    entries = [
        ("w1ab", w1ab, _KPAD),
        ("w1b", params["w1b"], H),
        ("w2a", params["w2a"], H),
        ("w2b", params["w2b"], H),
        ("w3a", params["w3a"], H),
        ("w3b", params["w3b"], H),
        ("wg1x", params["wg1"][:H], H),
        ("wg1s", params["wg1"][H:], _KPAD),
        ("wg2", params["wg2"], twoH),
        ("wm41x", params["wm41"][:H], H),
        ("wm41g", params["wm41"][H:], H),
        ("wm42", params["wm42"], H),
        ("wm51", params["wm51"], P2),
        ("wm52", params["wm52"], P4),
    ]
    woff, parts, r = {}, [], 0
    for name, arr, rows_store in entries:
        blk = jnp.zeros((rows_store, SW), f32)
        blk = blk.at[: arr.shape[0], : arr.shape[1]].set(arr.astype(f32))
        parts.append(blk)
        woff[name] = r
        r += rows_store
    w_slab = jnp.concatenate(parts, axis=0).astype(jnp.bfloat16)

    b1ab = jnp.concatenate([params["b1a"], params["b1s"]], axis=1)   # (1, 2H)
    bias_entries = [
        ("b1ab", b1ab), ("b1b", params["b1b"]),
        ("b2a", params["b2a"]), ("b2b", params["b2b"]),
        ("b3a", params["b3a"]), ("b3b", params["b3b"]),
        ("bg1", params["bg1"]), ("bg2", params["bg2"]),
        ("bm41", params["bm41"]), ("bm42", params["bm42"]),
        ("bm51", params["bm51"]), ("bm52", params["bm52"]),
    ]
    brow = {}
    b_slab = jnp.zeros((len(bias_entries), SW), f32)
    for i, (name, arr) in enumerate(bias_entries):
        b_slab = b_slab.at[i, : arr.shape[1]].set(arr[0].astype(f32))
        brow[name] = i

    return w_slab, b_slab, woff, brow, {"P2": P2, "P4": P4}


# ----------------------------------------------------------------------------
# Tiling choice
# ----------------------------------------------------------------------------
def _device_kind():
    try:
        return jax.devices()[0].device_kind.lower()
    except Exception:
        return ""


def _choose_tb(batch, n_points, num_cores, *, target_rows=512, max_rows=2048):
    """Samples folded per grid step: primary goal >= target_rows MXU rows per
    step; keep >= num_cores grid steps (v7x has 2 TensorCores); cap rows so
    the per-step activation footprint fits v7x's 64 MiB VMEM."""
    def ok(d):
        # BlockSpec rule: when G > 1, R = d*n_points must be a multiple of 8.
        return batch // d == 1 or (d * n_points) % 8 == 0

    divisors = [d for d in range(1, batch + 1) if batch % d == 0 and ok(d)]
    cands = [d for d in divisors if d * n_points <= max_rows] or [min(divisors)]
    pref = [d for d in cands if d * n_points >= target_rows and batch // d >= num_cores]
    if pref:
        return min(pref)                       # smallest fold that fills the MXU
    pref = [d for d in cands if batch // d >= num_cores]
    if pref:
        return max(pref)                       # keep every core fed, maximize rows
    return max(cands)                          # small batch: fold everything


# ----------------------------------------------------------------------------
# Wrapper
# ----------------------------------------------------------------------------
def electron_beam_pointnet(initial_state, settings, params, tb=None):
    """initial_state: (B, N, 6), settings: (B, 6) -> (B, N, 6)."""
    B, N, C = initial_state.shape
    H = params["w1b"].shape[0]
    out_dim = params["wm52"].shape[1]
    assert H % 16 == 0, "hidden_dim must be a multiple of 16 (128 is optimal)"
    assert C <= _KPAD

    kind = _device_kind()
    num_cores = 2 if ("v7" in kind or "7x" in kind) else 1
    bf16_acts = any(t in kind for t in ("v6", "v7", "7x"))  # v5e: keep f32 acts
    act_dtype = jnp.bfloat16 if bf16_acts else jnp.float32

    if tb is None:
        tb = _choose_tb(B, N, num_cores)
    assert B % tb == 0, (B, tb)
    G = B // tb
    R = tb * N
    assert G == 1 or R % 8 == 0, (R, G)

    f32, bf16 = jnp.float32, jnp.bfloat16

    # ---- inputs: bf16, feature dim zero-padded 6 -> 16 ----
    x2d = jnp.pad(initial_state.astype(f32).reshape(B * N, C),
                  ((0, 0), (0, _KPAD - C))).astype(bf16)
    s3d = jnp.pad(settings.astype(f32), ((0, 0), (0, _KPAD - C))
                  ).astype(bf16).reshape(G, tb, _KPAD)

    w_slab, b_slab, woff, brow, dims = _pack_params(params, H)
    P2, P4 = dims["P2"], dims["P4"]
    twoH = 2 * H

    in_specs = [
        pl.BlockSpec((R, _KPAD), lambda g: (g, 0)),          # points
        pl.BlockSpec((1, tb, _KPAD), lambda g: (g, 0, 0)),   # settings
        pl.BlockSpec(w_slab.shape, lambda g: (0, 0)),        # packed bf16 weights
        pl.BlockSpec(b_slab.shape, lambda g: (0, 0)),        # packed f32 biases
    ]
    out_specs = pl.BlockSpec((R, out_dim), lambda g: (g, 0))  # (B*N, 6) directly

    # ---- cost estimate ----
    per_pt = _KPAD * twoH + 6 * H * H + H * P2 + P2 * P4 + P4 * _OUT_COLS
    glob = H * twoH + _KPAD * twoH + twoH * H + H * H
    flops = 2 * (B * N * per_pt + B * glob)
    bytes_accessed = (x2d.size * 2 + s3d.size * 2 + int(w_slab.size) * 2
                      + int(b_slab.size) * 4 + B * N * out_dim * 4)
    cost = pl.CostEstimate(flops=int(flops), transcendentals=0,
                           bytes_accessed=int(bytes_accessed))

    # ---- scoped-VMEM budget: capped at 48 MiB (headroom on v7x's 64 MiB) ----
    MiB = 1 << 20
    weight_bytes = int(w_slab.size) * 2 + int(b_slab.size) * 4
    io_bytes = R * _KPAD * 2 + tb * _KPAD * 2 + R * out_dim * 4
    act_itm = 2 if act_dtype == jnp.bfloat16 else 4
    act_bytes = R * (2 * twoH * 4 + 6 * H * act_itm + (P2 + P4 + _OUT_COLS) * 4)
    footprint = 2 * (weight_bytes + io_bytes) + act_bytes
    vmem_limit = int(min(48 * MiB, max(8 * MiB, 2 * footprint)))

    kernel = functools.partial(
        _ebpn_kernel, tb=tb, npts=N, hidden=H, p2=P2, p4=P4,
        out_dim=out_dim, woff=woff, brow=brow, act_dtype=act_dtype)

    out = pl.pallas_call(
        kernel,
        out_shape=jax.ShapeDtypeStruct((B * N, out_dim), f32),
        grid=(G,),
        in_specs=in_specs,
        out_specs=out_specs,
        compiler_params=pltpu.CompilerParams(
            dimension_semantics=("parallel",),
            vmem_limit_bytes=vmem_limit,
        ),
        cost_estimate=cost,
    )(x2d, s3d, w_slab, b_slab)

    return out.reshape(B, N, out_dim)


# ----------------------------------------------------------------------------
# Deterministic parameter init (PyTorch nn.Linear-style uniform, transposed
# to (in, out) layout; biases stored as (1, out)).
# ----------------------------------------------------------------------------
def init_params(hidden_dim, key):
    def linear(key, fan_in, fan_out):
        kw, kb = jax.random.split(key)
        bound = 1.0 / jnp.sqrt(fan_in)
        w = jax.random.uniform(kw, (fan_in, fan_out), jnp.float32, -bound, bound)
        b = jax.random.uniform(kb, (1, fan_out), jnp.float32, -bound, bound)
        return w, b

    H = hidden_dim
    keys = jax.random.split(key, 13)
    p = {}
    p["w1a"], p["b1a"] = linear(keys[0], 6, H)
    p["w1b"], p["b1b"] = linear(keys[1], H, H)
    p["w1s"], p["b1s"] = linear(keys[2], 6, H)
    p["w2a"], p["b2a"] = linear(keys[3], H, H)
    p["w2b"], p["b2b"] = linear(keys[4], H, H)
    p["w3a"], p["b3a"] = linear(keys[5], H, H)
    p["w3b"], p["b3b"] = linear(keys[6], H, H)
    p["wg1"], p["bg1"] = linear(keys[7], H + 6, 2 * H)
    p["wg2"], p["bg2"] = linear(keys[8], 2 * H, H)
    p["wm41"], p["bm41"] = linear(keys[9], 2 * H, H)
    p["wm42"], p["bm42"] = linear(keys[10], H, H // 2)
    p["wm51"], p["bm51"] = linear(keys[11], H // 2, H // 4)
    p["wm52"], p["bm52"] = linear(keys[12], H // 4, 6)
    return p


# ----------------------------------------------------------------------------
# Pure-JAX f32 reference (mirrors the PyTorch forward exactly)
# ----------------------------------------------------------------------------
def reference_forward(initial_state, settings, p):
    def lin(x, w, b):
        return x @ w + b

    x = initial_state
    idt = lin(x, p["w1s"], p["b1s"])
    h = jax.nn.relu(lin(x, p["w1a"], p["b1a"]))
    x = jax.nn.relu(lin(h, p["w1b"], p["b1b"]) + idt)
    h = jax.nn.relu(lin(x, p["w2a"], p["b2a"]))
    x = jax.nn.relu(lin(h, p["w2b"], p["b2b"]) + x)
    h = jax.nn.relu(lin(x, p["w3a"], p["b3a"]))
    x = jax.nn.relu(lin(h, p["w3b"], p["b3b"]) + x)
    g = jnp.max(x, axis=1)
    g = jnp.concatenate([g, settings], axis=1)
    g = jax.nn.relu(lin(g, p["wg1"], p["bg1"]))
    g = jax.nn.relu(lin(g, p["wg2"], p["bg2"]))
    g_exp = jnp.broadcast_to(g[:, None, :], (x.shape[0], x.shape[1], g.shape[-1]))
    xc = jnp.concatenate([x, g_exp], axis=2)
    x = jax.nn.relu(lin(xc, p["wm41"], p["bm41"]))
    x = jax.nn.relu(lin(x, p["wm42"], p["bm42"]))
    x = jax.nn.relu(lin(x, p["wm51"], p["bm51"]))
    x = lin(x, p["wm52"], p["bm52"])
    return x


if __name__ == "__main__":
    B, N, HIDDEN = 2, 64, 128  # small batch / point count, module default hidden_dim

    key = jax.random.PRNGKey(0)
    k_params, k_state, k_set = jax.random.split(key, 3)

    params = init_params(HIDDEN, k_params)
    initial_state = jax.random.normal(k_state, (B, N, 6), jnp.float32)
    settings = jax.random.normal(k_set, (B, 6), jnp.float32)

    out = electron_beam_pointnet(initial_state, settings, params)
    out = jax.block_until_ready(out)

    ref = reference_forward(initial_state, settings, params)
    assert out.shape == (B, N, 6)
    max_err = float(jnp.max(jnp.abs(out - ref)))
    # bf16 weights (and, on v6e/v7x, bf16 carried activations) inside the
    # kernel with f32 accumulation -> loosened tolerance vs. the f32 reference.
    assert jnp.allclose(out, ref, atol=8e-2, rtol=8e-2), max_err

    print("KERNEL_OK")
</pallas_src>

<mosaic_0001>
module attributes {stable_mosaic.version = 11 : i64} {
  func.func @_ebpn_kernel(%arg0: i32, %arg1: memref<128x16xbf16, #tpu.memory_space<vmem>>, %arg2: memref<1x2x16xbf16, #tpu.memory_space<vmem>>, %arg3: memref<1696x256xbf16, #tpu.memory_space<vmem>>, %arg4: memref<12x256xf32, #tpu.memory_space<vmem>>, %arg5: memref<128x6xf32, #tpu.memory_space<vmem>>) attributes {dimension_semantics = [#tpu.dimension_semantics<parallel>], iteration_bounds = array<i64: 1>, scalar_prefetch = 0 : i64, scratch_operands = 0 : i64, tpu.core_type = #tpu.core_type<tc>, window_params = [{transform_indices = @transform_0, window_bounds = array<i64: 128, 16>}, {transform_indices = @transform_1, window_bounds = array<i64: 1, 2, 16>}, {pipeline_mode = #tpu.pipeline_mode<synchronous>, transform_indices = @transform_2, window_bounds = array<i64: 1696, 256>}, {pipeline_mode = #tpu.pipeline_mode<synchronous>, transform_indices = @transform_3, window_bounds = array<i64: 12, 256>}, {transform_indices = @transform_4, window_bounds = array<i64: 128, 6>}]} {
    %c0 = arith.constant 0 : index
    %c0_0 = arith.constant 0 : index
    %0 = vector.load %arg1[%c0, %c0_0] : memref<128x16xbf16, #tpu.memory_space<vmem>>, vector<128x16xbf16>
    %c0_1 = arith.constant 0 : index
    %c0_2 = arith.constant 0 : index
    %1 = vector.load %arg3[%c0_1, %c0_2] : memref<1696x256xbf16, #tpu.memory_space<vmem>>, vector<16x256xbf16>
    %cst = arith.constant dense<0.000000e+00> : vector<128x256xf32>
    %2 = tpu.matmul %0, %1, %cst {dimension_numbers = #tpu.dot_dimension_numbers<[1], [0], [0], [1], [0, 0, 1, 1], [], []>} : vector<128x16xbf16>, vector<16x256xbf16>, vector<128x256xf32> -> vector<128x256xf32>
    %c0_3 = arith.constant 0 : index
    %c0_4 = arith.constant 0 : index
    %3 = vector.load %arg4[%c0_3, %c0_4] : memref<12x256xf32, #tpu.memory_space<vmem>>, vector<1x256xf32>
    %4 = vector.broadcast %3 : vector<1x256xf32> to vector<128x256xf32>
    %5 = arith.addf %2, %4 : vector<128x256xf32>
    %6 = vector.extract_strided_slice %5 {offsets = [0, 0], sizes = [128, 128], strides = [1, 1]} : vector<128x256xf32> to vector<128x128xf32>
    %cst_5 = arith.constant 0.000000e+00 : f32
    %7 = vector.broadcast %cst_5 : f32 to vector<128x128xf32>
    %8 = arith.maximumf %6, %7 : vector<128x128xf32>
    %9 = vector.extract_strided_slice %5 {offsets = [0, 128], sizes = [128, 128], strides = [1, 1]} : vector<128x256xf32> to vector<128x128xf32>
    %c16 = arith.constant 16 : index
    %c0_6 = arith.constant 0 : index
    %10 = vector.load %arg3[%c16, %c0_6] : memref<1696x256xbf16, #tpu.memory_space<vmem>>, vector<128x128xbf16>
    %11 = arith.truncf %8 : vector<128x128xf32> to vector<128x128xbf16>
    %cst_7 = arith.constant dense<0.000000e+00> : vector<128x128xf32>
    %12 = tpu.matmul %11, %10, %cst_7 {dimension_numbers = #tpu.dot_dimension_numbers<[1], [0], [0], [1], [0, 0, 1, 1], [], []>} : vector<128x128xbf16>, vector<128x128xbf16>, vector<128x128xf32> -> vector<128x128xf32>
    %c1 = arith.constant 1 : index
    %c0_8 = arith.constant 0 : index
    %13 = vector.load %arg4[%c1, %c0_8] : memref<12x256xf32, #tpu.memory_space<vmem>>, vector<1x128xf32>
    %14 = vector.broadcast %13 : vector<1x128xf32> to vector<128x128xf32>
    %15 = arith.addf %12, %14 : vector<128x128xf32>
    %16 = arith.addf %15, %9 : vector<128x128xf32>
    %cst_9 = arith.constant 0.000000e+00 : f32
    %17 = vector.broadcast %cst_9 : f32 to vector<128x128xf32>
    %18 = arith.maximumf %16, %17 : vector<128x128xf32>
    %c144 = arith.constant 144 : index
    %c0_10 = arith.constant 0 : index
    %19 = vector.load %arg3[%c144, %c0_10] : memref<1696x256xbf16, #tpu.memory_space<vmem>>, vector<128x128xbf16>
    %20 = arith.truncf %18 : vector<128x128xf32> to vector<128x128xbf16>
    %cst_11 = arith.constant dense<0.000000e+00> : vector<128x128xf32>
    %21 = tpu.matmul %20, %19, %cst_11 {dimension_numbers = #tpu.dot_dimension_numbers<[1], [0], [0], [1], [0, 0, 1, 1], [], []>} : vector<128x128xbf16>, vector<128x128xbf16>, vector<128x128xf32> -> vector<128x128xf32>
    %c2 = arith.constant 2 : index
    %c0_12 = arith.constant 0 : index
    %22 = vector.load %arg4[%c2, %c0_12] : memref<12x256xf32, #tpu.memory_space<vmem>>, vector<1x128xf32>
    %23 = vector.broadcast %22 : vector<1x128xf32> to vector<128x128xf32>
    %24 = arith.addf %21, %23 : vector<128x128xf32>
    %cst_13 = arith.constant 0.000000e+00 : f32
    %25 = vector.broadcast %cst_13 : f32 to vector<128x128xf32>
    %26 = arith.maximumf %24, %25 : vector<128x128xf32>
    %c272 = arith.constant 272 : index
    %c0_14 = arith.constant 0 : index
    %27 = vector.load %arg3[%c272, %c0_14] : memref<1696x256xbf16, #tpu.memory_space<vmem>>, vector<128x128xbf16>
    %28 = arith.truncf %26 : vector<128x128xf32> to vector<128x128xbf16>
    %cst_15 = arith.constant dense<0.000000e+00> : vector<128x128xf32>
    %29 = tpu.matmul %28, %27, %cst_15 {dimension_numbers = #tpu.dot_dimension_numbers<[1], [0], [0], [1], [0, 0, 1, 1], [], []>} : vector<128x128xbf16>, vector<128x128xbf16>, vector<128x128xf32> -> vector<128x128xf32>
    %c3 = arith.constant 3 : index
    %c0_16 = arith.constant 0 : index
    %30 = vector.load %arg4[%c3, %c0_16] : memref<12x256xf32, #tpu.memory_space<vmem>>, vector<1x128xf32>
    %31 = vector.broadcast %30 : vector<1x128xf32> to vector<128x128xf32>
    %32 = arith.addf %29, %31 : vector<128x128xf32>
    %33 = arith.addf %32, %18 : vector<128x128xf32>
    %cst_17 = arith.constant 0.000000e+00 : f32
    %34 = vector.broadcast %cst_17 : f32 to vector<128x128xf32>
    %35 = arith.maximumf %33, %34 : vector<128x128xf32>
    %c400 = arith.constant 400 : index
    %c0_18 = arith.constant 0 : index
    %36 = vector.load %arg3[%c400, %c0_18] : memref<1696x256xbf16, #tpu.memory_space<vmem>>, vector<128x128xbf16>
    %37 = arith.truncf %35 : vector<128x128xf32> to vector<128x128xbf16>
    %cst_19 = arith.constant dense<0.000000e+00> : vector<128x128xf32>
    %38 = tpu.matmul %37, %36, %cst_19 {dimension_numbers = #tpu.dot_dimension_numbers<[1], [0], [0], [1], [0, 0, 1, 1], [], []>} : vector<128x128xbf16>, vector<128x128xbf16>, vector<128x128xf32> -> vector<128x128xf32>
    %c4 = arith.constant 4 : index
    %c0_20 = arith.constant 0 : index
    %39 = vector.load %arg4[%c4, %c0_20] : memref<12x256xf32, #tpu.memory_space<vmem>>, vector<1x128xf32>
    %40 = vector.broadcast %39 : vector<1x128xf32> to vector<128x128xf32>
    %41 = arith.addf %38, %40 : vector<128x128xf32>
    %cst_21 = arith.constant 0.000000e+00 : f32
    %42 = vector.broadcast %cst_21 : f32 to vector<128x128xf32>
    %43 = arith.maximumf %41, %42 : vector<128x128xf32>
    %c528 = arith.constant 528 : index
    %c0_22 = arith.constant 0 : index
    %44 = vector.load %arg3[%c528, %c0_22] : memref<1696x256xbf16, #tpu.memory_space<vmem>>, vector<128x128xbf16>
    %45 = arith.truncf %43 : vector<128x128xf32> to vector<128x128xbf16>
    %cst_23 = arith.constant dense<0.000000e+00> : vector<128x128xf32>
    %46 = tpu.matmul %45, %44, %cst_23 {dimension_numbers = #tpu.dot_dimension_numbers<[1], [0], [0], [1], [0, 0, 1, 1], [], []>} : vector<128x128xbf16>, vector<128x128xbf16>, vector<128x128xf32> -> vector<128x128xf32>
    %c5 = arith.constant 5 : index
    %c0_24 = arith.constant 0 : index
    %47 = vector.load %arg4[%c5, %c0_24] : memref<12x256xf32, #tpu.memory_space<vmem>>, vector<1x128xf32>
    %48 = vector.broadcast %47 : vector<1x128xf32> to vector<128x128xf32>
    %49 = arith.addf %46, %48 : vector<128x128xf32>
    %50 = arith.addf %49, %35 : vector<128x128xf32>
    %cst_25 = arith.constant 0.000000e+00 : f32
    %51 = vector.broadcast %cst_25 : f32 to vector<128x128xf32>
    %52 = arith.maximumf %50, %51 : vector<128x128xf32>
    %53 = vector.shape_cast %52 : vector<128x128xf32> to vector<2x64x128xf32>
    %cst_26 = arith.constant dense<0xFF800000> : vector<2x128xf32>
    %54 = vector.multi_reduction <maximumf>, %53, %cst_26 [1] : vector<2x64x128xf32> to vector<2x128xf32>
    %c0_27 = arith.constant 0 : index
    %c0_28 = arith.constant 0 : index
    %c0_29 = arith.constant 0 : index
    %55 = vector.load %arg2[%c0_27, %c0_28, %c0_29] : memref<1x2x16xbf16, #tpu.memory_space<vmem>>, vector<1x2x16xbf16>
    %56 = vector.shape_cast %55 : vector<1x2x16xbf16> to vector<2x16xbf16>
    %c656 = arith.constant 656 : index
    %c0_30 = arith.constant 0 : index
    %57 = vector.load %arg3[%c656, %c0_30] : memref<1696x256xbf16, #tpu.memory_space<vmem>>, vector<128x256xbf16>
    %58 = arith.truncf %54 : vector<2x128xf32> to vector<2x128xbf16>
    %cst_31 = arith.constant dense<0.000000e+00> : vector<2x256xf32>
    %59 = tpu.matmul %58, %57, %cst_31 {dimension_numbers = #tpu.dot_dimension_numbers<[1], [0], [0], [1], [0, 0, 1, 1], [], []>} : vector<2x128xbf16>, vector<128x256xbf16>, vector<2x256xf32> -> vector<2x256xf32>
    %c784 = arith.constant 784 : index
    %c0_32 = arith.constant 0 : index
    %60 = vector.load %arg3[%c784, %c0_32] : memref<1696x256xbf16, #tpu.memory_space<vmem>>, vector<16x256xbf16>
    %cst_33 = arith.constant dense<0.000000e+00> : vector<2x256xf32>
    %61 = tpu.matmul %56, %60, %cst_33 {dimension_numbers = #tpu.dot_dimension_numbers<[1], [0], [0], [1], [0, 0, 1, 1], [], []>} : vector<2x16xbf16>, vector<16x256xbf16>, vector<2x256xf32> -> vector<2x256xf32>
    %62 = arith.addf %59, %61 : vector<2x256xf32>
    %c6 = arith.constant 6 : index
    %c0_34 = arith.constant 0 : index
    %63 = vector.load %arg4[%c6, %c0_34] : memref<12x256xf32, #tpu.memory_space<vmem>>, vector<1x256xf32>
    %64 = vector.broadcast %63 : vector<1x256xf32> to vector<2x256xf32>
    %65 = arith.addf %62, %64 : vector<2x256xf32>
    %cst_35 = arith.constant 0.000000e+00 : f32
    %66 = vector.broadcast %cst_35 : f32 to vector<2x256xf32>
    %67 = arith.maximumf %65, %66 : vector<2x256xf32>
    %c800 = arith.constant 800 : index
    %c0_36 = arith.constant 0 : index
    %68 = vector.load %arg3[%c800, %c0_36] : memref<1696x256xbf16, #tpu.memory_space<vmem>>, vector<256x128xbf16>
    %69 = arith.truncf %67 : vector<2x256xf32> to vector<2x256xbf16>
    %cst_37 = arith.constant dense<0.000000e+00> : vector<2x128xf32>
    %70 = tpu.matmul %69, %68, %cst_37 {dimension_numbers = #tpu.dot_dimension_numbers<[1], [0], [0], [1], [0, 0, 1, 1], [], []>} : vector<2x256xbf16>, vector<256x128xbf16>, vector<2x128xf32> -> vector<2x128xf32>
    %c7 = arith.constant 7 : index
    %c0_38 = arith.constant 0 : index
    %71 = vector.load %arg4[%c7, %c0_38] : memref<12x256xf32, #tpu.memory_space<vmem>>, vector<1x128xf32>
    %72 = vector.broadcast %71 : vector<1x128xf32> to vector<2x128xf32>
    %73 = arith.addf %70, %72 : vector<2x128xf32>
    %cst_39 = arith.constant 0.000000e+00 : f32
    %74 = vector.broadcast %cst_39 : f32 to vector<2x128xf32>
    %75 = arith.maximumf %73, %74 : vector<2x128xf32>
    %c1184 = arith.constant 1184 : index
    %c0_40 = arith.constant 0 : index
    %76 = vector.load %arg3[%c1184, %c0_40] : memref<1696x256xbf16, #tpu.memory_space<vmem>>, vector<128x128xbf16>
    %77 = arith.truncf %75 : vector<2x128xf32> to vector<2x128xbf16>
    %cst_41 = arith.constant dense<0.000000e+00> : vector<2x128xf32>
    %78 = tpu.matmul %77, %76, %cst_41 {dimension_numbers = #tpu.dot_dimension_numbers<[1], [0], [0], [1], [0, 0, 1, 1], [], []>} : vector<2x128xbf16>, vector<128x128xbf16>, vector<2x128xf32> -> vector<2x128xf32>
    %79 = vector.shape_cast %78 : vector<2x128xf32> to vector<2x1x128xf32>
    %80 = vector.shape_cast %79 : vector<2x1x128xf32> to vector<2x1x128xf32>
    %81 = vector.broadcast %80 : vector<2x1x128xf32> to vector<2x64x128xf32>
    %82 = vector.shape_cast %81 : vector<2x64x128xf32> to vector<128x128xf32>
    %c1056 = arith.constant 1056 : index
    %c0_42 = arith.constant 0 : index
    %83 = vector.load %arg3[%c1056, %c0_42] : memref<1696x256xbf16, #tpu.memory_space<vmem>>, vector<128x128xbf16>
    %84 = arith.truncf %52 : vector<128x128xf32> to vector<128x128xbf16>
    %cst_43 = arith.constant dense<0.000000e+00> : vector<128x128xf32>
    %85 = tpu.matmul %84, %83, %cst_43 {dimension_numbers = #tpu.dot_dimension_numbers<[1], [0], [0], [1], [0, 0, 1, 1], [], []>} : vector<128x128xbf16>, vector<128x128xbf16>, vector<128x128xf32> -> vector<128x128xf32>
    %86 = arith.addf %85, %82 : vector<128x128xf32>
    %c8 = arith.constant 8 : index
    %c0_44 = arith.constant 0 : index
    %87 = vector.load %arg4[%c8, %c0_44] : memref<12x256xf32, #tpu.memory_space<vmem>>, vector<1x128xf32>
    %88 = vector.broadcast %87 : vector<1x128xf32> to vector<128x128xf32>
    %89 = arith.addf %86, %88 : vector<128x128xf32>
    %cst_45 = arith.constant 0.000000e+00 : f32
    %90 = vector.broadcast %cst_45 : f32 to vector<128x128xf32>
    %91 = arith.maximumf %89, %90 : vector<128x128xf32>
    %c1312 = arith.constant 1312 : index
    %c0_46 = arith.constant 0 : index
    %92 = vector.load %arg3[%c1312, %c0_46] : memref<1696x256xbf16, #tpu.memory_space<vmem>>, vector<128x128xbf16>
    %93 = arith.truncf %91 : vector<128x128xf32> to vector<128x128xbf16>
    %cst_47 = arith.constant dense<0.000000e+00> : vector<128x128xf32>
    %94 = tpu.matmul %93, %92, %cst_47 {dimension_numbers = #tpu.dot_dimension_numbers<[1], [0], [0], [1], [0, 0, 1, 1], [], []>} : vector<128x128xbf16>, vector<128x128xbf16>, vector<128x128xf32> -> vector<128x128xf32>
    %c9 = arith.constant 9 : index
    %c0_48 = arith.constant 0 : index
    %95 = vector.load %arg4[%c9, %c0_48] : memref<12x256xf32, #tpu.memory_space<vmem>>, vector<1x128xf32>
    %96 = vector.broadcast %95 : vector<1x128xf32> to vector<128x128xf32>
    %97 = arith.addf %94, %96 : vector<128x128xf32>
    %cst_49 = arith.constant 0.000000e+00 : f32
    %98 = vector.broadcast %cst_49 : f32 to vector<128x128xf32>
    %99 = arith.maximumf %97, %98 : vector<128x128xf32>
    %c1440 = arith.constant 1440 : index
    %c0_50 = arith.constant 0 : index
    %100 = vector.load %arg3[%c1440, %c0_50] : memref<1696x256xbf16, #tpu.memory_space<vmem>>, vector<128x128xbf16>
    %101 = arith.truncf %99 : vector<128x128xf32> to vector<128x128xbf16>
    %cst_51 = arith.constant dense<0.000000e+00> : vector<128x128xf32>
    %102 = tpu.matmul %101, %100, %cst_51 {dimension_numbers = #tpu.dot_dimension_numbers<[1], [0], [0], [1], [0, 0, 1, 1], [], []>} : vector<128x128xbf16>, vector<128x128xbf16>, vector<128x128xf32> -> vector<128x128xf32>
    %c10 = arith.constant 10 : index
    %c0_52 = arith.constant 0 : index
    %103 = vector.load %arg4[%c10, %c0_52] : memref<12x256xf32, #tpu.memory_space<vmem>>, vector<1x128xf32>
    %104 = vector.broadcast %103 : vector<1x128xf32> to vector<128x128xf32>
    %105 = arith.addf %102, %104 : vector<128x128xf32>
    %cst_53 = arith.constant 0.000000e+00 : f32
    %106 = vector.broadcast %cst_53 : f32 to vector<128x128xf32>
    %107 = arith.maximumf %105, %106 : vector<128x128xf32>
    %c1568 = arith.constant 1568 : index
    %c0_54 = arith.constant 0 : index
    %108 = vector.load %arg3[%c1568, %c0_54] : memref<1696x256xbf16, #tpu.memory_space<vmem>>, vector<128x128xbf16>
    %109 = arith.truncf %107 : vector<128x128xf32> to vector<128x128xbf16>
    %cst_55 = arith.constant dense<0.000000e+00> : vector<128x128xf32>
    %110 = tpu.matmul %109, %108, %cst_55 {dimension_numbers = #tpu.dot_dimension_numbers<[1], [0], [0], [1], [0, 0, 1, 1], [], []>} : vector<128x128xbf16>, vector<128x128xbf16>, vector<128x128xf32> -> vector<128x128xf32>
    %c11 = arith.constant 11 : index
    %c0_56 = arith.constant 0 : index
    %111 = vector.load %arg4[%c11, %c0_56] : memref<12x256xf32, #tpu.memory_space<vmem>>, vector<1x128xf32>
    %112 = vector.broadcast %111 : vector<1x128xf32> to vector<128x128xf32>
    %113 = arith.addf %110, %112 : vector<128x128xf32>
    %114 = vector.extract_strided_slice %113 {offsets = [0, 0], sizes = [128, 6], strides = [1, 1]} : vector<128x128xf32> to vector<128x6xf32>
    %c0_57 = arith.constant 0 : index
    %c0_58 = arith.constant 0 : index
    %115 = vector.load %arg5[%c0_57, %c0_58] : memref<128x6xf32, #tpu.memory_space<vmem>>, vector<128x6xf32>
    tpu.vector_store %arg5[%c0_57, %c0_58], %114 {strides = array<i32>} : memref<128x6xf32, #tpu.memory_space<vmem>>, vector<128x6xf32>,
    return
  }
  func.func @transform_0(%arg0: i32) -> (i32, i32) {
    %c0_i32 = arith.constant 0 : i32
    %c0_i32_0 = arith.constant 0 : i32
    return %arg0, %c0_i32 : i32, i32
  }
  func.func @transform_1(%arg0: i32) -> (i32, i32, i32) {
    %c0_i32 = arith.constant 0 : i32
    %c0_i32_0 = arith.constant 0 : i32
    %c0_i32_1 = arith.constant 0 : i32
    return %arg0, %c0_i32, %c0_i32_0 : i32, i32, i32
  }
  func.func @transform_2(%arg0: i32) -> (i32, i32) {
    %c0_i32 = arith.constant 0 : i32
    %c0_i32_0 = arith.constant 0 : i32
    %c0_i32_1 = arith.constant 0 : i32
    return %c0_i32, %c0_i32_0 : i32, i32
  }
  func.func @transform_3(%arg0: i32) -> (i32, i32) {
    %c0_i32 = arith.constant 0 : i32
    %c0_i32_0 = arith.constant 0 : i32
    %c0_i32_1 = arith.constant 0 : i32
    return %c0_i32, %c0_i32_0 : i32, i32
  }
  func.func @transform_4(%arg0: i32) -> (i32, i32) {
    %c0_i32 = arith.constant 0 : i32
    %c0_i32_0 = arith.constant 0 : i32
    return %arg0, %c0_i32 : i32, i32
  }
}

</mosaic_0001>

<bundles_post_ra>
// kernel: tpu_custom_call.1
= control target key start
LH: loop header
LB: loop body
LE: loop exit
PB: predicated region body
PF: predicated region fallthrough
CT: control target
= control target key end

     0   :  { %9 = vsyncpa [#allocation3], 0  ;;  %s3349_s15 = smov [#allocation2]   ;;  %s3986_s0 = inlined_call_operand.vmem [shape: bf16[128,16], index: 0, kind: input, shape index: {}]   ;;  %s3987_s1 = inlined_call_operand.vmem [shape: bf16[1,2,16], index: 1, kind: input, shape index: {}]   ;;  %s3988_s2 = inlined_call_operand.hbm [shape: bf16[1696,256], index: 2, kind: input, shape index: {}]   ;;  %s3989_s3 = inlined_call_operand.vmem [shape: f32[12,256], index: 3, kind: input, shape index: {}]   ;;  %s3990_s4 = inlined_call_operand.vmem [shape: f32[128,6], index: 4, kind: output, shape index: {}]  }
   0x1   :  { %s19_s16 = sshll.u32 %s3349_s15, 4  ;;  %s3325_s19 = scalar_lea.hbm %s3988_s2, 27136  ;;  %s20_s16 = int_to_ptr.vmem [resolvable:$true] %s19_s16 }
   0x2   :  { %p3326_p0 = scmp.ne.s32.totalorder %s3988_s2, %s3325_s19  ;;  %p3329_p1 = scmp.lt.u32.totalorder %s3325_s19, %s3988_s2 }
   0x4   :  { %p3331_p2 = pnand %p3329_p1, %p3326_p0 }
   0x6   :  { %3334 = shalt.err (!%p3331_p2)
}
   0x7   :  { %s3335_s24 = scalar_lea.vmem %s20_s16, 27136  ;;  %p3340_p4 = scmp.lt.s32.totalorder %s20_s16, %s20_s16 }
   0x8   :  { %p3336_p3 = scmp.ne.s32.totalorder %s20_s16, %s3335_s24  ;;  %p3341_p5 = scmp.lt.s32.totalorder %s3335_s24, %s3335_s24 }
   0xa   :  { %p3342_p6 = por %p3341_p5, %p3340_p4 }
   0xc   :  { %p3343_p7 = pnand %p3342_p6, %p3336_p3 }
   0xe   :  { %3346 = shalt.err (!%p3343_p7)
}
   0xf   :  { %s3350_s25 = smov 128   ;;  %s3351_s26 = smov 8  }
  0x10   :  { %25 = dma.hbm_to_vmem [thread:$0]  %s3988_s2, 27136, %s20_s16, [#allocation3], %s3350_s25, %s3350_s25, %s3351_s26  }
  0x11   :  { %3347 = dma.done.wait [#allocation3], 27136  }
  0x12   :  { %3348 = vsyncadd [#allocation3], 4294940160  ;;  %v3352_v0 = vmov 0   ;;  %v3191_v1 = vld [vmem:[#allocation2 + $0x4] ss:$8 sps:$4 sm:$0xff]   ;;  %vm112_vm0 = vcmask 130048   ;;  %v52_v20 = vlaneseq }
  0x13   :  { %169 = vmatprep.mubr.bf16.mxu0 %v3352_v0  ;;  %v3193_v2 = vld [vmem:[#allocation2] ss:$8 sps:$4 sm:$0xff]   ;;  %137 = vmatprep.subr.bf16.mxu0 %v3191_v1  ;;  %v3202_v5 = vld [vmem:[#allocation2 + $0x10] ss:$8 sps:$4 sm:$0xff]   ;;  %vm1349_vm1 = vcmask 1041409   ;;  %vm3354_vm2 = vmmov 0  }
  0x14   :  { %v3194_v3 = vld [vmem:[%s3986_s0] sm:$0xff]   ;;  %138 = vmatpush1.bf16.msra.mxu0 %v3193_v2  ;;  %v3195_v4 = vld [vmem:[%s3986_s0 + $0x8] sm:$0xff]   ;;  %2876 = vmatprep.subr.bf16.mxu1 %v3202_v5  ;;  %v3204_v7 = vld [vmem:[#allocation2 + $0x30] ss:$8 sps:$4 sm:$0xff]   ;;  %v3433_v21 = vshrl.u32 %v52_v20, 7  ;;  %vm2545_vm3 = vcmask 48128  }
  0x15   :  { %v3203_v6 = vld [vmem:[#allocation2 + $0x20] ss:$8 sps:$4 sm:$0xff]   ;;  %2877 = vmatpush3.bf16.msra.mxu1 %v3202_v5  ;;  %v3196_v8 = vld [vmem:[%s3986_s0 + $0x10] sm:$0xff]   ;;  %v3197_v10 = vld [vmem:[%s3986_s0 + $0x18] sm:$0xff]  }
  0x16   :  { %2878 = vmatprep.subr.bf16.mxu1 %v3203_v6  ;;  %v3205_v9 = vld [vmem:[#allocation2 + $0x40] ss:$8 sps:$4 sm:$0xff]   ;;  %v3200_v13 = vld [vmem:[%s3986_s0 + $0x30] sm:$0xff]   ;;  %v3201_v14 = vld [vmem:[%s3986_s0 + $0x38] sm:$0xff]   ;;  %v3436_v22 = vsub.s32 0, %v3433_v21 }
  0x17   :  { %2577 = vmatmul.mubr.msk.bf16.vlgmr.msra.gmra.mrb[0].mxu0 %vm112_vm0, %v3194_v3  ;;  %v3198_v11 = vld [vmem:[%s3986_s0 + $0x20] sm:$0xff]   ;;  %v3199_v12 = vld [vmem:[%s3986_s0 + $0x28] sm:$0xff]   ;;  %v3206_v15 = vld [vmem:[#allocation2 + $0x50] ss:$8 sps:$4 sm:$0xff]  }
  0x18   :  { %179 = vmatprep.mubr.bf16.mxu0 %v3352_v0  ;;  %v3207_v16 = vld [vmem:[#allocation2 + $0x60] ss:$8 sps:$4 sm:$0xff]   ;;  %v3208_v17 = vld [vmem:[#allocation2 + $0x70] ss:$8 sps:$4 sm:$0xff]  }
  0x19   :  { %2879 = vmatpush3.bf16.msra.mxu1 %v3203_v6  ;;  %v3209_v18 = vld [vmem:[#allocation2 + $0x80] ss:$8 sps:$4 sm:$0xff]   ;;  %v3210_v19 = vld [vmem:[#allocation2 + $0x90] ss:$8 sps:$4 sm:$0xff]  }
  0x1a   :  { %2880 = vmatprep.subr.bf16.mxu1 %v3204_v7  ;;  %v3441_v23 = vld [vmem:[%s3989_s3] ss:$8 sm:$0x3]  ;;  %v3212_v50 = vld [vmem:[#allocation2 + $0xb0] ss:$8 sps:$4 sm:$0xff]  }
  0x1b   :  { %v3445_v24 = vrot.slane %v3441_v23, %v3436_v22  ;;  %v3211_v43 = vld [vmem:[#allocation2 + $0xa0] ss:$8 sps:$4 sm:$0xff]   ;;  %v3214_v61 = vld [vmem:[#allocation2 + $0xd0] ss:$8 sps:$4 sm:$0xff]  }
  0x1c   :  { %v3213_v54 = vld [vmem:[#allocation2 + $0xc0] ss:$8 sps:$4 sm:$0xff]  }
  0x1d   :  { %2881 = vmatpush3.bf16.msra.mxu1 %v3204_v7 }
  0x1e   :  { %2882 = vmatprep.subr.bf16.mxu1 %v3205_v9 }
  0x1f   :  { %2578 = vmatmul.mubr.msk.bf16.gmra.mrb[4].mxu0 %vm112_vm0, %v3195_v4 }
  0x20   :  { %189 = vmatprep.mubr.bf16.mxu0 %v3352_v0 }
  0x21   :  { %2883 = vmatpush3.bf16.msra.mxu1 %v3205_v9 }
  0x22   :  { %2884 = vmatprep.subr.bf16.mxu1 %v3206_v15 }
  0x25   :  { %2885 = vmatpush3.bf16.msra.mxu1 %v3206_v15 }
  0x26   :  { %2886 = vmatprep.subr.bf16.mxu1 %v3207_v16 }
  0x27   :  { %2579 = vmatmul.mubr.msk.bf16.gmra.mrb[8].mxu0 %vm112_vm0, %v3196_v8 }
  0x28   :  { %199 = vmatprep.mubr.bf16.mxu0 %v3352_v0 }
  0x29   :  { %2887 = vmatpush3.bf16.msra.mxu1 %v3207_v16 }
  0x2a   :  { %2888 = vmatprep.subr.bf16.mxu1 %v3208_v17 }
  0x2d   :  { %2889 = vmatpush3.bf16.msra.mxu1 %v3208_v17 }
  0x2e   :  { %2890 = vmatprep.subr.bf16.mxu1 %v3209_v18 }
  0x2f   :  { %2580 = vmatmul.mubr.msk.bf16.gmra.mrb[12].mxu0 %vm112_vm0, %v3197_v10 }
  0x30   :  { %209 = vmatprep.mubr.bf16.mxu0 %v3352_v0 }
  0x31   :  { %2891 = vmatpush3.bf16.msra.mxu1 %v3209_v18 }
  0x32   :  { %2908 = vmatprep.subr.bf16.mxu1 %v3210_v19 }
  0x37   :  { %2581 = vmatmul.mubr.msk.bf16.gmra.mrb[16].mxu0 %vm112_vm0, %v3198_v11 }
  0x38   :  { %219 = vmatprep.mubr.bf16.mxu0 %v3352_v0 }
  0x3f   :  { %2582 = vmatmul.mubr.msk.bf16.gmra.mrb[20].mxu0 %vm112_vm0, %v3199_v12 }
  0x40   :  { %229 = vmatprep.mubr.bf16.mxu0 %v3352_v0 }
  0x47   :  { %2583 = vmatmul.mubr.msk.bf16.gmra.mrb[24].mxu0 %vm112_vm0, %v3200_v13 }
  0x48   :  { %239 = vmatprep.mubr.bf16.mxu0 %v3352_v0 }
  0x4f   :  { %2584 = vmatmul.mubr.msk.bf16.gmra.mrb[28].mxu0 %vm112_vm0, %v3201_v14 }
  0xea   :  { %v171_v25 = vpop.f32.mrb[0].mxu0 }
  0xeb   :  { %v172_v26 = vadd.f32 %v171_v25, %v3445_v24  ;;  %v3448_v27 = vpop.f32.mrb[1].mxu0 }
  0xec   :  { %v175_v28 = vpop.f32.mrb[2].mxu0 }
  0xed   :  { %v176_v29 = vadd.f32 %v175_v28, %v3445_v24  ;;  %v3451_v30 = vpop.f32.mrb[3].mxu0  ;;  %v250_v31 = vmax.f32 %v172_v26, 0.0 }
  0xef   :  { %v251_v32 = vmax.f32 %v176_v29, 0.0 }
  0xf1   :  { %v282_v33 = vpack.c.bf16 %v251_v32, %v250_v31 }
  0xf2   :  { %v181_v34 = vpop.f32.mrb[4].mxu0 }
  0xf3   :  { %v182_v35 = vadd.f32 %v181_v34, %v3445_v24  ;;  %v3454_v36 = vpop.f32.mrb[5].mxu0  ;;  %2892 = vmatprep.mubr.bf16.mxu1 %v282_v33 }
  0xf4   :  { %v185_v37 = vpop.f32.mrb[6].mxu0 }
  0xf5   :  { %v186_v38 = vadd.f32 %v185_v37, %v3445_v24  ;;  %v3457_v39 = vpop.f32.mrb[7].mxu0  ;;  %v252_v40 = vmax.f32 %v182_v35, 0.0 }
  0xf7   :  { %v253_v41 = vmax.f32 %v186_v38, 0.0 }
  0xf9   :  { %v283_v42 = vpack.c.bf16 %v253_v41, %v252_v40 }
  0xfa   :  { %v191_v44 = vpop.f32.mrb[8].mxu0 }
  0xfb   :  { %v192_v45 = vadd.f32 %v191_v44, %v3445_v24  ;;  %v3460_v46 = vpop.f32.mrb[9].mxu0  ;;  %2893 = vmatmul.mubr.bf16.vlgmr.msra.gmra.mrb[0].mxu1 %v283_v42 }
  0xfc   :  { %v195_v47 = vpop.f32.mrb[10].mxu0  ;;  %2909 = vmatpush3.bf16.msra.mxu1 %v3210_v19 }
  0xfd   :  { %v196_v48 = vadd.f32 %v195_v47, %v3445_v24  ;;  %v3463_v49 = vpop.f32.mrb[11].mxu0  ;;  %2910 = vmatprep.subr.bf16.mxu1 %v3211_v43  ;;  %v254_v51 = vmax.f32 %v192_v45, 0.0  ;;  %v3215_v47 = vld [vmem:[#allocation2 + $0xe0] ss:$8 sps:$4 sm:$0xff]  }
  0xff   :  { %v255_v52 = vmax.f32 %v196_v48, 0.0  ;;  %v3216_v48 = vld [vmem:[#allocation2 + $0xf0] ss:$8 sps:$4 sm:$0xff]  }
 0x100   :  { %2911 = vmatpush3.bf16.msra.mxu1 %v3211_v43 }
 0x101   :  { %v284_v53 = vpack.c.bf16 %v255_v52, %v254_v51  ;;  %2912 = vmatprep.subr.bf16.mxu1 %v3212_v50  ;;  %v3218_v51 = vld [vmem:[#allocation2 + $0x110] ss:$8 sps:$4 sm:$0xff]   ;;  %v3219_v52 = vld [vmem:[#allocation2 + $0x120] ss:$8 sps:$4 sm:$0xff]  }
 0x102   :  { %v201_v55 = vpop.f32.mrb[12].mxu0  ;;  %2940 = vmatprep.subr.bf16.mxu0 %v3218_v51 }
 0x103   :  { %v202_v56 = vadd.f32 %v201_v55, %v3445_v24  ;;  %v3466_v57 = vpop.f32.mrb[13].mxu0  ;;  %2896 = vmatprep.mubr.bf16.mxu1 %v284_v53  ;;  %2941 = vmatpush3.bf16.msra.mxu0 %v3218_v51  ;;  %v3221_v53 = vld [vmem:[#allocation2 + $0x140] ss:$8 sps:$4 sm:$0xff]  }
 0x104   :  { %v205_v58 = vpop.f32.mrb[14].mxu0  ;;  %2913 = vmatpush3.bf16.msra.mxu1 %v3212_v50  ;;  %v3217_v50 = vld [vmem:[#allocation2 + $0x100] ss:$8 sps:$4 sm:$0xff]   ;;  %2942 = vmatprep.subr.bf16.mxu0 %v3219_v52 }
 0x105   :  { %v206_v59 = vadd.f32 %v205_v58, %v3445_v24  ;;  %v3469_v60 = vpop.f32.mrb[15].mxu0  ;;  %2914 = vmatprep.subr.bf16.mxu1 %v3213_v54  ;;  %v256_v62 = vmax.f32 %v202_v56, 0.0  ;;  %v3223_v55 = vld [vmem:[#allocation2 + $0x160] ss:$8 sps:$4 sm:$0xff]   ;;  %v58_v56 = vsub.s32 1, %v3433_v21 }
 0x107   :  { %v257_v63 = vmax.f32 %v206_v59, 0.0  ;;  %2943 = vmatpush3.bf16.msra.mxu0 %v3219_v52  ;;  %v3499_v58 = vrot.slane %v3441_v23, %v58_v56  ;;  %v3504_v59 = vld [vmem:[%s3989_s3 + $0x1] ss:$0 sm:$0xff] }
 0x108   :  { %2915 = vmatpush3.bf16.msra.mxu1 %v3213_v54  ;;  %v3222_v54 = vld [vmem:[#allocation2 + $0x150] ss:$8 sps:$4 sm:$0xff]  }
 0x109   :  { %v285_v1 = vpack.c.bf16 %v257_v63, %v256_v62  ;;  %2916 = vmatprep.subr.bf16.mxu1 %v3214_v61  ;;  %v184_v62 = vadd.f32 %v3454_v36, %v3499_v58  ;;  %v188_v23 = vadd.f32 %v3457_v39, %v3499_v58  ;;  %v178_v36 = vadd.f32 %v3451_v30, %v3499_v58 }
 0x10a   :  { %v211_v2 = vpop.f32.mrb[16].mxu0 }
 0x10b   :  { %v212_v3 = vadd.f32 %v211_v2, %v3445_v24  ;;  %v3472_v4 = vpop.f32.mrb[17].mxu0  ;;  %2897 = vmatmul.mubr.bf16.gmra.mrb[4].mxu1 %v285_v1  ;;  %v174_v2 = vadd.f32 %v3448_v27, %v3499_v58 }
 0x10c   :  { %v215_v5 = vpop.f32.mrb[18].mxu0  ;;  %2917 = vmatpush3.bf16.msra.mxu1 %v3214_v61 }
 0x10d   :  { %v216_v6 = vadd.f32 %v215_v5, %v3445_v24  ;;  %v3475_v7 = vpop.f32.mrb[19].mxu0  ;;  %v258_v8 = vmax.f32 %v212_v3, 0.0  ;;  %2918 = vmatprep.subr.bf16.mxu1 %v3215_v47 }
 0x10f   :  { %v259_v9 = vmax.f32 %v216_v6, 0.0 }
 0x110   :  { %2919 = vmatpush3.bf16.msra.mxu1 %v3215_v47 }
 0x111   :  { %v286_v10 = vpack.c.bf16 %v259_v9, %v258_v8  ;;  %2920 = vmatprep.subr.bf16.mxu1 %v3216_v48 }
 0x112   :  { %v221_v11 = vpop.f32.mrb[20].mxu0 }
 0x113   :  { %v222_v12 = vadd.f32 %v221_v11, %v3445_v24  ;;  %v3478_v13 = vpop.f32.mrb[21].mxu0  ;;  %2900 = vmatprep.mubr.bf16.mxu1 %v286_v10 }
 0x114   :  { %v225_v14 = vpop.f32.mrb[22].mxu0  ;;  %2921 = vmatpush3.bf16.msra.mxu1 %v3216_v48  ;;  %v224_v52 = vadd.f32 %v3478_v13, %v3499_v58  ;;  %v218_v13 = vadd.f32 %v3475_v7, %v3499_v58 }
 0x115   :  { %v226_v15 = vadd.f32 %v225_v14, %v3445_v24  ;;  %v3481_v16 = vpop.f32.mrb[23].mxu0  ;;  %v260_v17 = vmax.f32 %v222_v12, 0.0  ;;  %2922 = vmatprep.subr.bf16.mxu1 %v3217_v50 }
 0x117   :  { %v261_v18 = vmax.f32 %v226_v15, 0.0 }
 0x118   :  { %2923 = vmatpush3.bf16.msra.mxu1 %v3217_v50 }
 0x119   :  { %v287_v19 = vpack.c.bf16 %v261_v18, %v260_v17 }
 0x11a   :  { %v231_v20 = vpop.f32.mrb[24].mxu0 }
 0x11b   :  { %v232_v25 = vadd.f32 %v231_v20, %v3445_v24  ;;  %v3484_v26 = vpop.f32.mrb[25].mxu0  ;;  %2901 = vmatmul.mubr.bf16.gmra.mrb[8].mxu1 %v287_v19  ;;  %v204_v20 = vadd.f32 %v3466_v57, %v3499_v58  ;;  %v198_v57 = vadd.f32 %v3463_v49, %v3499_v58 }
 0x11c   :  { %v235_v28 = vpop.f32.mrb[26].mxu0 }
 0x11d   :  { %v236_v29 = vadd.f32 %v235_v28, %v3445_v24  ;;  %v3487_v31 = vpop.f32.mrb[27].mxu0  ;;  %v262_v32 = vmax.f32 %v232_v25, 0.0 }
 0x11f   :  { %v263_v33 = vmax.f32 %v236_v29, 0.0  ;;  %v194_v29 = vadd.f32 %v3460_v46, %v3499_v58 }
 0x121   :  { %v288_v34 = vpack.c.bf16 %v263_v33, %v262_v32 }
 0x122   :  { %v241_v35 = vpop.f32.mrb[28].mxu0 }
 0x123   :  { %v242_v37 = vadd.f32 %v241_v35, %v3445_v24  ;;  %v3490_v38 = vpop.f32.mrb[29].mxu0  ;;  %2904 = vmatprep.mubr.bf16.mxu1 %v288_v34  ;;  %v208_v34 = vadd.f32 %v3469_v60, %v3499_v58 }
 0x124   :  { %v245_v40 = vpop.f32.mrb[30].mxu0 }
 0x125   :  { %v246_v41 = vadd.f32 %v245_v40, %v3445_v24  ;;  %v3493_v42 = vpop.f32.mrb[31].mxu0  ;;  %v264_v43 = vmax.f32 %v242_v37, 0.0  ;;  %v3220_v24 = vld [vmem:[#allocation2 + $0x130] ss:$8 sps:$4 sm:$0xff]  }
 0x126   :  { %2944 = vmatprep.subr.bf16.mxu0 %v3220_v24 }
 0x127   :  { %v265_v44 = vmax.f32 %v246_v41, 0.0  ;;  %2945 = vmatpush3.bf16.msra.mxu0 %v3220_v24 }
 0x128   :  { %2946 = vmatprep.subr.bf16.mxu0 %v3221_v53 }
 0x129   :  { %v289_v45 = vpack.c.bf16 %v265_v44, %v264_v43 }
 0x12b   :  { %2905 = vmatmul.mubr.bf16.gmra.mrb[12].mxu1 %v289_v45  ;;  %2947 = vmatpush3.bf16.msra.mxu0 %v3221_v53 }
 0x12c   :  { %2948 = vmatprep.subr.bf16.mxu0 %v3222_v54 }
 0x12f   :  { %2949 = vmatpush3.bf16.msra.mxu0 %v3222_v54  ;;  %v214_v54 = vadd.f32 %v3472_v4, %v3499_v58 }
 0x130   :  { %2950 = vmatprep.subr.bf16.mxu0 %v3223_v55 }
 0x133   :  { %2951 = vmatpush3.bf16.msra.mxu0 %v3223_v55 }
 0x1ce   :  { %v2894_v61 = vpop.f32.mrb[0].mxu1 }
 0x1cf   :  { %v382_v63 = vadd.f32 %v2894_v61, %v3504_v59  ;;  %v373_v1 = vpop.f32.mrb[1].mxu1 }
 0x1d0   :  { %v374_v3 = vadd.f32 %v373_v1, %v3504_v59  ;;  %v2895_v5 = vpop.f32.mrb[2].mxu1 }
 0x1d1   :  { %v3514_v6 = vadd.f32 %v382_v63, %v184_v62  ;;  %v385_v8 = vadd.f32 %v2895_v5, %v3504_v59  ;;  %v376_v9 = vpop.f32.mrb[3].mxu1  ;;  %v228_v62 = vadd.f32 %v3481_v16, %v3499_v58 }
 0x1d2   :  { %v3519_v10 = vadd.f32 %v374_v3, %v174_v2  ;;  %v377_v11 = vadd.f32 %v376_v9, %v3504_v59 }
 0x1d3   :  { %v3522_v12 = vadd.f32 %v385_v8, %v188_v23  ;;  %v454_v17 = vmax.f32 %v3514_v6, 0.0 }
 0x1d4   :  { %v3524_v27 = vadd.f32 %v377_v11, %v178_v36  ;;  %v452_v39 = vmax.f32 %v3519_v10, 0.0 }
 0x1d5   :  { %v455_v14 = vmax.f32 %v3522_v12, 0.0 }
 0x1d6   :  { %v453_v15 = vmax.f32 %v3524_v27, 0.0 }
 0x1d7   :  { %v485_v18 = vpack.c.bf16 %v455_v14, %v454_v17 }
 0x1d8   :  { %v484_v30 = vpack.c.bf16 %v453_v15, %v452_v39 }
 0x1da   :  { %2924 = vmatprep.mubr.bf16.mxu1 %v484_v30 }
 0x1db   :  { %2925 = vmatmul.mubr.bf16.vlgmr.msra.gmra.mrb[16].mxu1 %v485_v18  ;;  %v244_v18 = vadd.f32 %v3490_v38, %v3499_v58  ;;  %v238_v38 = vadd.f32 %v3487_v31, %v3499_v58 }
 0x1de   :  { %v2898_v19 = vpop.f32.mrb[4].mxu1 }
 0x1df   :  { %v398_v25 = vadd.f32 %v2898_v19, %v3504_v59  ;;  %v389_v28 = vpop.f32.mrb[5].mxu1 }
 0x1e0   :  { %v390_v32 = vadd.f32 %v389_v28, %v3504_v59  ;;  %v2899_v33 = vpop.f32.mrb[6].mxu1 }
 0x1e1   :  { %v3546_v35 = vadd.f32 %v398_v25, %v204_v20  ;;  %v401_v37 = vadd.f32 %v2899_v33, %v3504_v59  ;;  %v392_v40 = vpop.f32.mrb[7].mxu1  ;;  %v234_v25 = vadd.f32 %v3484_v26, %v3499_v58 }
 0x1e2   :  { %v3551_v41 = vadd.f32 %v390_v32, %v194_v29  ;;  %v393_v43 = vadd.f32 %v392_v40, %v3504_v59  ;;  %v248_v32 = vadd.f32 %v3493_v42, %v3499_v58 }
 0x1e3   :  { %v3554_v44 = vadd.f32 %v401_v37, %v208_v34  ;;  %v458_v48 = vmax.f32 %v3546_v35, 0.0 }
 0x1e4   :  { %v3556_v46 = vadd.f32 %v393_v43, %v198_v57  ;;  %v456_v60 = vmax.f32 %v3551_v41, 0.0 }
 0x1e5   :  { %v459_v45 = vmax.f32 %v3554_v44, 0.0 }
 0x1e6   :  { %v457_v47 = vmax.f32 %v3556_v46, 0.0 }
 0x1e7   :  { %v487_v50 = vpack.c.bf16 %v459_v45, %v458_v48 }
 0x1e8   :  { %v486_v49 = vpack.c.bf16 %v457_v47, %v456_v60 }
 0x1ea   :  { %2928 = vmatprep.mubr.bf16.mxu1 %v486_v49 }
 0x1eb   :  { %2929 = vmatmul.mubr.bf16.gmra.mrb[20].mxu1 %v487_v50 }
 0x1ee   :  { %v2902_v51 = vpop.f32.mrb[8].mxu1 }
 0x1ef   :  { %v414_v24 = vadd.f32 %v2902_v51, %v3504_v59  ;;  %v405_v53 = vpop.f32.mrb[9].mxu1 }
 0x1f0   :  { %v406_v55 = vadd.f32 %v405_v53, %v3504_v59  ;;  %v2903_v61 = vpop.f32.mrb[10].mxu1  ;;  %v3227_v53 = vld [vmem:[#allocation2 + $0x1a0] ss:$8 sps:$4 sm:$0xff]  }
 0x1f1   :  { %v3578_v63 = vadd.f32 %v414_v24, %v224_v52  ;;  %v417_v1 = vadd.f32 %v2903_v61, %v3504_v59  ;;  %v408_v2 = vpop.f32.mrb[11].mxu1  ;;  %v3225_v52 = vld [vmem:[#allocation2 + $0x180] ss:$8 sps:$4 sm:$0xff]   ;;  %v3226_v24 = vld [vmem:[#allocation2 + $0x190] ss:$8 sps:$4 sm:$0xff]  }
 0x1f2   :  { %v3583_v3 = vadd.f32 %v406_v55, %v214_v54  ;;  %v409_v5 = vadd.f32 %v408_v2, %v3504_v59  ;;  %2972 = vmatprep.subr.bf16.mxu1 %v3226_v24  ;;  %v3228_v54 = vld [vmem:[#allocation2 + $0x1b0] ss:$8 sps:$4 sm:$0xff]   ;;  %v3229_v55 = vld [vmem:[#allocation2 + $0x1c0] ss:$8 sps:$4 sm:$0xff]  }
 0x1f3   :  { %v3586_v23 = vadd.f32 %v417_v1, %v228_v62  ;;  %v462_v36 = vmax.f32 %v3578_v63, 0.0  ;;  %2973 = vmatpush3.bf16.msra.mxu1 %v3226_v24  ;;  %v3230_v61 = vld [vmem:[#allocation2 + $0x1d0] ss:$8 sps:$4 sm:$0xff]   ;;  %v492_v62 = vld [vmem:[%s3989_s3 + $0x2] ss:$0 sm:$0xff] }
 0x1f4   :  { %v3588_v4 = vadd.f32 %v409_v5, %v218_v13  ;;  %v460_v16 = vmax.f32 %v3583_v3, 0.0  ;;  %2974 = vmatprep.subr.bf16.mxu1 %v3227_v53 }
 0x1f5   :  { %v463_v8 = vmax.f32 %v3586_v23, 0.0 }
 0x1f6   :  { %v461_v9 = vmax.f32 %v3588_v4, 0.0 }
 0x1f7   :  { %v489_v11 = vpack.c.bf16 %v463_v8, %v462_v36  ;;  %2975 = vmatpush3.bf16.msra.mxu1 %v3227_v53 }
 0x1f8   :  { %v488_v7 = vpack.c.bf16 %v461_v9, %v460_v16  ;;  %2976 = vmatprep.subr.bf16.mxu1 %v3228_v54 }
 0x1fa   :  { %2932 = vmatprep.mubr.bf16.mxu1 %v488_v7 }
 0x1fb   :  { %2933 = vmatmul.mubr.bf16.gmra.mrb[24].mxu1 %v489_v11 }
 0x1fc   :  { %2977 = vmatpush3.bf16.msra.mxu1 %v3228_v54 }
 0x1fd   :  { %2978 = vmatprep.subr.bf16.mxu1 %v3229_v55 }
 0x1fe   :  { %v2906_v30 = vpop.f32.mrb[12].mxu1 }
 0x1ff   :  { %v430_v19 = vadd.f32 %v2906_v30, %v3504_v59  ;;  %v421_v20 = vpop.f32.mrb[13].mxu1 }
 0x200   :  { %v422_v28 = vadd.f32 %v421_v20, %v3504_v59  ;;  %v2907_v29 = vpop.f32.mrb[14].mxu1  ;;  %2979 = vmatpush3.bf16.msra.mxu1 %v3229_v55 }
 0x201   :  { %v3610_v33 = vadd.f32 %v430_v19, %v244_v18  ;;  %v433_v34 = vadd.f32 %v2907_v29, %v3504_v59  ;;  %v424_v37 = vpop.f32.mrb[15].mxu1  ;;  %2980 = vmatprep.subr.bf16.mxu1 %v3230_v61 }
 0x202   :  { %v3615_v40 = vadd.f32 %v422_v28, %v234_v25  ;;  %v425_v57 = vadd.f32 %v424_v37, %v3504_v59  ;;  %v3224_v59 = vld [vmem:[#allocation2 + $0x170] ss:$8 sps:$4 sm:$0xff]  }
 0x203   :  { %v3618_v43 = vadd.f32 %v433_v34, %v248_v32  ;;  %v466_v51 = vmax.f32 %v3610_v33, 0.0  ;;  %2952 = vmatprep.subr.bf16.mxu0 %v3224_v59 }
 0x204   :  { %v3620_v26 = vadd.f32 %v425_v57, %v238_v38  ;;  %v464_v42 = vmax.f32 %v3615_v40, 0.0  ;;  %2953 = vmatpush3.bf16.msra.mxu0 %v3224_v59  ;;  %2981 = vmatpush3.bf16.msra.mxu1 %v3230_v61 }
 0x205   :  { %v467_v49 = vmax.f32 %v3618_v43, 0.0  ;;  %2954 = vmatprep.subr.bf16.mxu0 %v3225_v52 }
 0x206   :  { %v465_v50 = vmax.f32 %v3620_v26, 0.0  ;;  %v3240_v26 = vld [vmem:[#allocation2 + $0x270] ss:$8 sps:$4 sm:$0xff]  }
 0x207   :  { %v491_v58 = vpack.c.bf16 %v467_v49, %v466_v51 }
 0x208   :  { %v490_v31 = vpack.c.bf16 %v465_v50, %v464_v42  ;;  %2955 = vmatpush3.bf16.msra.mxu0 %v3225_v52 }
 0x20a   :  { %2936 = vmatprep.mubr.bf16.mxu1 %v490_v31 }
 0x20b   :  { %2937 = vmatmul.mubr.bf16.gmra.mrb[28].mxu1 %v491_v58 }
 0x2ae   :  { %v2926_v1 = vpop.f32.mrb[16].mxu1 }
 0x2af   :  { %v584_v2 = vadd.f32 %v2926_v1, %v492_v62  ;;  %v575_v13 = vpop.f32.mrb[17].mxu1 }
 0x2b0   :  { %v576_v5 = vadd.f32 %v575_v13, %v492_v62  ;;  %v2927_v7 = vpop.f32.mrb[18].mxu1 }
 0x2b1   :  { %v587_v11 = vadd.f32 %v2927_v7, %v492_v62  ;;  %v578_v30 = vpop.f32.mrb[19].mxu1  ;;  %v640_v19 = vmax.f32 %v584_v2, 0.0 }
 0x2b2   :  { %v579_v18 = vadd.f32 %v578_v30, %v492_v62  ;;  %v638_v25 = vmax.f32 %v576_v5, 0.0 }
 0x2b3   :  { %v641_v20 = vmax.f32 %v587_v11, 0.0 }
 0x2b4   :  { %v639_v28 = vmax.f32 %v579_v18, 0.0 }
 0x2b5   :  { %v671_v29 = vpack.c.bf16 %v641_v20, %v640_v19 }
 0x2b6   :  { %v670_v32 = vpack.c.bf16 %v639_v28, %v638_v25 }
 0x2b8   :  { %2956 = vmatprep.mubr.bf16.mxu0 %v670_v32 }
 0x2b9   :  { %2957 = vmatmul.mubr.bf16.vlgmr.msra.gmra.mrb[32].mxu0 %v671_v29 }
 0x2be   :  { %v2930_v34 = vpop.f32.mrb[20].mxu1 }
 0x2bf   :  { %v600_v37 = vadd.f32 %v2930_v34, %v492_v62  ;;  %v591_v38 = vpop.f32.mrb[21].mxu1 }
 0x2c0   :  { %v592_v57 = vadd.f32 %v591_v38, %v492_v62  ;;  %v2931_v31 = vpop.f32.mrb[22].mxu1 }
 0x2c1   :  { %v603_v58 = vadd.f32 %v2931_v31, %v492_v62  ;;  %v594_v59 = vpop.f32.mrb[23].mxu1  ;;  %v644_v24 = vmax.f32 %v600_v37, 0.0 }
 0x2c2   :  { %v595_v52 = vadd.f32 %v594_v59, %v492_v62  ;;  %v642_v54 = vmax.f32 %v592_v57, 0.0 }
 0x2c3   :  { %v645_v53 = vmax.f32 %v603_v58, 0.0 }
 0x2c4   :  { %v643_v55 = vmax.f32 %v595_v52, 0.0 }
 0x2c5   :  { %v673_v61 = vpack.c.bf16 %v645_v53, %v644_v24 }
 0x2c6   :  { %v672_v1 = vpack.c.bf16 %v643_v55, %v642_v54 }
 0x2c8   :  { %2960 = vmatprep.mubr.bf16.mxu0 %v672_v1 }
 0x2c9   :  { %2961 = vmatmul.mubr.bf16.gmra.mrb[36].mxu0 %v673_v61 }
 0x2ce   :  { %v2934_v2 = vpop.f32.mrb[24].mxu1 }
 0x2cf   :  { %v616_v13 = vadd.f32 %v2934_v2, %v492_v62  ;;  %v607_v5 = vpop.f32.mrb[25].mxu1 }
 0x2d0   :  { %v608_v7 = vadd.f32 %v607_v5, %v492_v62  ;;  %v2935_v11 = vpop.f32.mrb[26].mxu1  ;;  %v3232_v5 = vld [vmem:[#allocation2 + $0x1f0] ss:$8 sps:$4 sm:$0xff]  }
 0x2d1   :  { %v619_v30 = vadd.f32 %v2935_v11, %v492_v62  ;;  %v610_v18 = vpop.f32.mrb[27].mxu1  ;;  %v648_v20 = vmax.f32 %v616_v13, 0.0  ;;  %v3231_v13 = vld [vmem:[#allocation2 + $0x1e0] ss:$8 sps:$4 sm:$0xff]   ;;  %v3234_v11 = vld [vmem:[#allocation2 + $0x210] ss:$8 sps:$4 sm:$0xff]  }
 0x2d2   :  { %v611_v19 = vadd.f32 %v610_v18, %v492_v62  ;;  %v646_v28 = vmax.f32 %v608_v7, 0.0  ;;  %2982 = vmatprep.subr.bf16.mxu1 %v3231_v13  ;;  %v3233_v7 = vld [vmem:[#allocation2 + $0x200] ss:$8 sps:$4 sm:$0xff]   ;;  %3004 = vmatprep.subr.bf16.mxu0 %v3234_v11 }
 0x2d3   :  { %v649_v25 = vmax.f32 %v619_v30, 0.0  ;;  %2983 = vmatpush3.bf16.msra.mxu1 %v3231_v13  ;;  %v3235_v30 = vld [vmem:[#allocation2 + $0x220] ss:$8 sps:$4 sm:$0xff]   ;;  %3005 = vmatpush3.bf16.msra.mxu0 %v3234_v11 }
 0x2d4   :  { %v647_v29 = vmax.f32 %v611_v19, 0.0  ;;  %2984 = vmatprep.subr.bf16.mxu1 %v3232_v5  ;;  %3006 = vmatprep.subr.bf16.mxu0 %v3235_v30  ;;  %v3237_v18 = vld [vmem:[#allocation2 + $0x240] ss:$8 sps:$4 sm:$0xff]   ;;  %v3238_v19 = vld [vmem:[#allocation2 + $0x250] ss:$8 sps:$4 sm:$0xff]  }
 0x2d5   :  { %v675_v32 = vpack.c.bf16 %v649_v25, %v648_v20  ;;  %v3239_v20 = vld [vmem:[#allocation2 + $0x260] ss:$8 sps:$4 sm:$0xff]  }
 0x2d6   :  { %v674_v34 = vpack.c.bf16 %v647_v29, %v646_v28  ;;  %v3640_v25 = vld [vmem:[%s3989_s3 + $0x3] ss:$0 sm:$0xff] }
 0x2d7   :  { %2985 = vmatpush3.bf16.msra.mxu1 %v3232_v5  ;;  %3007 = vmatpush3.bf16.msra.mxu0 %v3235_v30 }
 0x2d8   :  { %2964 = vmatprep.mubr.bf16.mxu0 %v674_v34  ;;  %2986 = vmatprep.subr.bf16.mxu1 %v3233_v7 }
 0x2d9   :  { %2965 = vmatmul.mubr.bf16.gmra.mrb[40].mxu0 %v675_v32 }
 0x2db   :  { %2987 = vmatpush3.bf16.msra.mxu1 %v3233_v7 }
 0x2de   :  { %v2938_v37 = vpop.f32.mrb[28].mxu1 }
 0x2df   :  { %v632_v38 = vadd.f32 %v2938_v37, %v492_v62  ;;  %v623_v57 = vpop.f32.mrb[29].mxu1 }
 0x2e0   :  { %v624_v31 = vadd.f32 %v623_v57, %v492_v62  ;;  %v2939_v58 = vpop.f32.mrb[30].mxu1 }
 0x2e1   :  { %v635_v59 = vadd.f32 %v2939_v58, %v492_v62  ;;  %v626_v52 = vpop.f32.mrb[31].mxu1  ;;  %v652_v53 = vmax.f32 %v632_v38, 0.0 }
 0x2e2   :  { %v627_v24 = vadd.f32 %v626_v52, %v492_v62  ;;  %v650_v55 = vmax.f32 %v624_v31, 0.0  ;;  %v3236_v62 = vld [vmem:[#allocation2 + $0x230] ss:$8 sps:$4 sm:$0xff]  }
 0x2e3   :  { %v653_v54 = vmax.f32 %v635_v59, 0.0  ;;  %3008 = vmatprep.subr.bf16.mxu0 %v3236_v62 }
 0x2e4   :  { %v651_v61 = vmax.f32 %v627_v24, 0.0  ;;  %3009 = vmatpush3.bf16.msra.mxu0 %v3236_v62 }
 0x2e5   :  { %v677_v1 = vpack.c.bf16 %v653_v54, %v652_v53  ;;  %3010 = vmatprep.subr.bf16.mxu0 %v3237_v18 }
 0x2e6   :  { %v676_v2 = vpack.c.bf16 %v651_v61, %v650_v55 }
 0x2e8   :  { %2968 = vmatprep.mubr.bf16.mxu0 %v676_v2  ;;  %3011 = vmatpush3.bf16.msra.mxu0 %v3237_v18 }
 0x2e9   :  { %2969 = vmatmul.mubr.bf16.gmra.mrb[44].mxu0 %v677_v1  ;;  %3012 = vmatprep.subr.bf16.mxu0 %v3238_v19 }
 0x2ec   :  { %3013 = vmatpush3.bf16.msra.mxu0 %v3238_v19 }
 0x2ed   :  { %3014 = vmatprep.subr.bf16.mxu0 %v3239_v20 }
 0x2f0   :  { %3015 = vmatpush3.bf16.msra.mxu0 %v3239_v20 }
 0x2f1   :  { %3016 = vmatprep.subr.bf16.mxu0 %v3240_v26 }
 0x2f4   :  { %3017 = vmatpush3.bf16.msra.mxu0 %v3240_v26 }
 0x38c   :  { %v2958_v28 = vpop.f32.mrb[32].mxu0 }
 0x38d   :  { %v770_v29 = vadd.f32 %v2958_v28, %v3640_v25  ;;  %v761_v32 = vpop.f32.mrb[33].mxu0 }
 0x38e   :  { %v762_v34 = vadd.f32 %v761_v32, %v3640_v25  ;;  %v2959_v37 = vpop.f32.mrb[34].mxu0 }
 0x38f   :  { %v773_v38 = vadd.f32 %v2959_v37, %v3640_v25  ;;  %v764_v57 = vpop.f32.mrb[35].mxu0  ;;  %v3652_v59 = vadd.f32 %v770_v29, %v454_v17 }
 0x390   :  { %v3647_v31 = vadd.f32 %v762_v34, %v452_v39  ;;  %v765_v58 = vadd.f32 %v764_v57, %v3640_v25 }
 0x391   :  { %v3656_v52 = vadd.f32 %v773_v38, %v455_v14  ;;  %v842_v54 = vmax.f32 %v3652_v59, 0.0 }
 0x392   :  { %v3660_v24 = vadd.f32 %v765_v58, %v453_v15  ;;  %v840_v10 = vmax.f32 %v3647_v31, 0.0 }
 0x393   :  { %v843_v53 = vmax.f32 %v3656_v52, 0.0 }
 0x394   :  { %v841_v39 = vmax.f32 %v3660_v24, 0.0 }
 0x395   :  { %v873_v12 = vpack.c.bf16 %v843_v53, %v842_v54 }
 0x396   :  { %v872_v6 = vpack.c.bf16 %v841_v39, %v840_v10 }
 0x398   :  { %2988 = vmatprep.mubr.bf16.mxu1 %v872_v6 }
 0x399   :  { %2989 = vmatmul.mubr.bf16.vlgmr.msra.gmra.mrb[32].mxu1 %v873_v12 }
 0x39c   :  { %v2962_v27 = vpop.f32.mrb[36].mxu0 }
 0x39d   :  { %v786_v14 = vadd.f32 %v2962_v27, %v3640_v25  ;;  %v777_v15 = vpop.f32.mrb[37].mxu0 }
 0x39e   :  { %v778_v17 = vadd.f32 %v777_v15, %v3640_v25  ;;  %v2963_v55 = vpop.f32.mrb[38].mxu0 }
 0x39f   :  { %v789_v61 = vadd.f32 %v2963_v55, %v3640_v25  ;;  %v780_v1 = vpop.f32.mrb[39].mxu0  ;;  %v3684_v5 = vadd.f32 %v786_v14, %v458_v48 }
 0x3a0   :  { %v3679_v2 = vadd.f32 %v778_v17, %v456_v60  ;;  %v781_v13 = vadd.f32 %v780_v1, %v3640_v25 }
 0x3a1   :  { %v3688_v7 = vadd.f32 %v789_v61, %v459_v45  ;;  %v846_v62 = vmax.f32 %v3684_v5, 0.0 }
 0x3a2   :  { %v3692_v11 = vadd.f32 %v781_v13, %v457_v47  ;;  %v844_v41 = vmax.f32 %v3679_v2, 0.0 }
 0x3a3   :  { %v847_v30 = vmax.f32 %v3688_v7, 0.0 }
 0x3a4   :  { %v845_v60 = vmax.f32 %v3692_v11, 0.0 }
 0x3a5   :  { %v875_v44 = vpack.c.bf16 %v847_v30, %v846_v62 }
 0x3a6   :  { %v874_v35 = vpack.c.bf16 %v845_v60, %v844_v41 }
 0x3a8   :  { %2992 = vmatprep.mubr.bf16.mxu1 %v874_v35 }
 0x3a9   :  { %2993 = vmatmul.mubr.bf16.gmra.mrb[36].mxu1 %v875_v44 }
 0x3ac   :  { %v2966_v46 = vpop.f32.mrb[40].mxu0 }
 0x3ad   :  { %v802_v45 = vadd.f32 %v2966_v46, %v3640_v25  ;;  %v793_v47 = vpop.f32.mrb[41].mxu0 }
 0x3ae   :  { %v794_v48 = vadd.f32 %v793_v47, %v3640_v25  ;;  %v2967_v18 = vpop.f32.mrb[42].mxu0 }
 0x3af   :  { %v805_v19 = vadd.f32 %v2967_v18, %v3640_v25  ;;  %v796_v20 = vpop.f32.mrb[43].mxu0  ;;  %v3716_v32 = vadd.f32 %v802_v45, %v462_v36 }
 0x3b0   :  { %v3711_v28 = vadd.f32 %v794_v48, %v460_v16  ;;  %v797_v29 = vadd.f32 %v796_v20, %v3640_v25 }
 0x3b1   :  { %v3720_v34 = vadd.f32 %v805_v19, %v463_v8  ;;  %v850_v57 = vmax.f32 %v3716_v32, 0.0 }
 0x3b2   :  { %v3724_v37 = vadd.f32 %v797_v29, %v461_v9  ;;  %v848_v3 = vmax.f32 %v3711_v28, 0.0 }
 0x3b3   :  { %v851_v38 = vmax.f32 %v3720_v34, 0.0 }
 0x3b4   :  { %v849_v16 = vmax.f32 %v3724_v37, 0.0 }
 0x3b5   :  { %v877_v23 = vpack.c.bf16 %v851_v38, %v850_v57 }
 0x3b6   :  { %v876_v63 = vpack.c.bf16 %v849_v16, %v848_v3 }
 0x3b8   :  { %2996 = vmatprep.mubr.bf16.mxu1 %v876_v63 }
 0x3b9   :  { %2997 = vmatmul.mubr.bf16.gmra.mrb[40].mxu1 %v877_v23 }
 0x3bc   :  { %v2970_v4 = vpop.f32.mrb[44].mxu0 }
 0x3bd   :  { %v818_v8 = vadd.f32 %v2970_v4, %v3640_v25  ;;  %v809_v9 = vpop.f32.mrb[45].mxu0 }
 0x3be   :  { %v810_v36 = vadd.f32 %v809_v9, %v3640_v25  ;;  %v2971_v58 = vpop.f32.mrb[46].mxu0 }
 0x3bf   :  { %v821_v6 = vadd.f32 %v2971_v58, %v3640_v25  ;;  %v812_v12 = vpop.f32.mrb[47].mxu0  ;;  %v3748_v15 = vadd.f32 %v818_v8, %v466_v51 }
 0x3c0   :  { %v3743_v27 = vadd.f32 %v810_v36, %v464_v42  ;;  %v813_v14 = vadd.f32 %v812_v12, %v3640_v25 }
 0x3c1   :  { %v3752_v17 = vadd.f32 %v821_v6, %v467_v49  ;;  %v854_v25 = vmax.f32 %v3748_v15, 0.0  ;;  %v3241_v49 = vld [vmem:[#allocation2 + $0x280] ss:$8 sps:$4 sm:$0xff]  }
 0x3c2   :  { %v3756_v55 = vadd.f32 %v813_v14, %v465_v50  ;;  %v852_v40 = vmax.f32 %v3743_v27, 0.0  ;;  %3018 = vmatprep.subr.bf16.mxu0 %v3241_v49  ;;  %v880_v50 = vld [vmem:[%s3989_s3 + $0x4] ss:$0 sm:$0xff] }
 0x3c3   :  { %v855_v61 = vmax.f32 %v3752_v17, 0.0  ;;  %3019 = vmatpush3.bf16.msra.mxu0 %v3241_v49 }
 0x3c4   :  { %v853_v42 = vmax.f32 %v3756_v55, 0.0 }
 0x3c5   :  { %v879_v43 = vpack.c.bf16 %v855_v61, %v854_v25 }
 0x3c6   :  { %v878_v33 = vpack.c.bf16 %v853_v42, %v852_v40 }
 0x3c8   :  { %3000 = vmatprep.mubr.bf16.mxu1 %v878_v33 }
 0x3c9   :  { %3001 = vmatmul.mubr.bf16.gmra.mrb[44].mxu1 %v879_v43 }
 0x3ca   :  { %1336 = vmatprep.mubr.bf16.mxu1 %v3352_v0 }
 0x46c   :  { %v2990_v51 = vpop.f32.mrb[32].mxu1 }
 0x46d   :  { %v972_v1 = vadd.f32 %v2990_v51, %v880_v50  ;;  %v963_v13 = vpop.f32.mrb[33].mxu1 }
 0x46e   :  { %v964_v35 = vadd.f32 %v963_v13, %v880_v50  ;;  %v2991_v44 = vpop.f32.mrb[34].mxu1 }
 0x46f   :  { %v975_v46 = vadd.f32 %v2991_v44, %v880_v50  ;;  %v966_v45 = vpop.f32.mrb[35].mxu1  ;;  %v1028_v48 = vmax.f32 %v972_v1, 0.0 }
 0x470   :  { %v967_v47 = vadd.f32 %v966_v45, %v880_v50  ;;  %v1026_v19 = vmax.f32 %v964_v35, 0.0 }
 0x471   :  { %v1029_v18 = vmax.f32 %v975_v46, 0.0 }
 0x472   :  { %v1027_v20 = vmax.f32 %v967_v47, 0.0 }
 0x473   :  { %v1059_v29 = vpack.c.bf16 %v1029_v18, %v1028_v48 }
 0x474   :  { %v1058_v63 = vpack.c.bf16 %v1027_v20, %v1026_v19 }
 0x476   :  { %3020 = vmatprep.mubr.bf16.mxu0 %v1058_v63 }
 0x477   :  { %3021 = vmatmul.mubr.bf16.vlgmr.msra.gmra.mrb[48].mxu0 %v1059_v29 }
 0x47c   :  { %v2994_v23 = vpop.f32.mrb[36].mxu1 }
 0x47d   :  { %v988_v4 = vadd.f32 %v2994_v23, %v880_v50  ;;  %v979_v8 = vpop.f32.mrb[37].mxu1 }
 0x47e   :  { %v980_v9 = vadd.f32 %v979_v8, %v880_v50  ;;  %v2995_v36 = vpop.f32.mrb[38].mxu1 }
 0x47f   :  { %v991_v58 = vadd.f32 %v2995_v36, %v880_v50  ;;  %v982_v6 = vpop.f32.mrb[39].mxu1  ;;  %v1032_v14 = vmax.f32 %v988_v4, 0.0 }
 0x480   :  { %v983_v12 = vadd.f32 %v982_v6, %v880_v50  ;;  %v1030_v43 = vmax.f32 %v980_v9, 0.0 }
 0x481   :  { %v1033_v33 = vmax.f32 %v991_v58, 0.0 }
 0x482   :  { %v1031_v26 = vmax.f32 %v983_v12, 0.0 }
 0x483   :  { %v1061_v49 = vpack.c.bf16 %v1033_v33, %v1032_v14 }
 0x484   :  { %v1060_v51 = vpack.c.bf16 %v1031_v26, %v1030_v43 }
 0x486   :  { %3024 = vmatprep.mubr.bf16.mxu0 %v1060_v51 }
 0x487   :  { %3025 = vmatmul.mubr.bf16.gmra.mrb[52].mxu0 %v1061_v49 }
 0x48c   :  { %v2998_v1 = vpop.f32.mrb[40].mxu1 }
 0x48d   :  { %v1004_v13 = vadd.f32 %v2998_v1, %v880_v50  ;;  %v995_v35 = vpop.f32.mrb[41].mxu1 }
 0x48e   :  { %v996_v44 = vadd.f32 %v995_v35, %v880_v50  ;;  %v2999_v46 = vpop.f32.mrb[42].mxu1  ;;  %v3245_v35 = vld [vmem:[#allocation2 + $0x290] ss:$8 sps:$4 sm:$0xff]  }
 0x48f   :  { %v1007_v45 = vadd.f32 %v2999_v46, %v880_v50  ;;  %v998_v47 = vpop.f32.mrb[43].mxu1  ;;  %v1036_v18 = vmax.f32 %v1004_v13, 0.0  ;;  %v3247_v13 = vld [vmem:[#allocation2 + $0x294] ss:$8 sps:$4 sm:$0xff]   ;;  %v3248_v46 = vld [vmem:[#allocation2 + $0x2a0] ss:$8 sps:$4 sm:$0xff]  }
 0x490   :  { %v999_v48 = vadd.f32 %v998_v47, %v880_v50  ;;  %v1034_v20 = vmax.f32 %v996_v44, 0.0  ;;  %1433 = vmatprep.subr.bf16.mxu0 %v3247_v13  ;;  %v3250_v44 = vld [vmem:[#allocation2 + $0x2a4] ss:$8 sps:$4 sm:$0xff]   ;;  %v3244_v47 = vld [vmem:[#allocation2 + $0x314] ss:$8 sps:$4 sm:$0xff]  }
 0x491   :  { %v1037_v19 = vmax.f32 %v1007_v45, 0.0  ;;  %1434 = vmatpush1.bf16.msra.mxu0 %v3245_v35  ;;  %v3253_v45 = vld [vmem:[#allocation2 + $0x2b4] ss:$8 sps:$4 sm:$0xff]   ;;  %1304 = vmatprep.subr.bf16.mxu1 %v3244_v47  ;;  %v3782_v13 = vld [vmem:[%s3989_s3 + $0x5] ss:$0 sm:$0xff] }
 0x492   :  { %v1035_v29 = vmax.f32 %v999_v48, 0.0  ;;  %1435 = vmatprep.subr.bf16.mxu0 %v3250_v44  ;;  %v3251_v48 = vld [vmem:[#allocation2 + $0x2b0] ss:$8 sps:$4 sm:$0xff]  }
 0x493   :  { %v1063_v63 = vpack.c.bf16 %v1037_v19, %v1036_v18  ;;  %v3256_v18 = vld [vmem:[#allocation2 + $0x2c4] ss:$8 sps:$4 sm:$0xff]   ;;  %v3254_v19 = vld [vmem:[#allocation2 + $0x2c0] ss:$8 sps:$4 sm:$0xff]  }
 0x494   :  { %v1062_v23 = vpack.c.bf16 %v1035_v29, %v1034_v20  ;;  %v3257_v20 = vld [vmem:[#allocation2 + $0x2d0] ss:$8 sps:$4 sm:$0xff]   ;;  %v3262_v29 = vld [vmem:[#allocation2 + $0x2e4] ss:$8 sps:$4 sm:$0xff]  }
 0x495   :  { %1436 = vmatpush1.bf16.msra.mxu0 %v3248_v46 }
 0x496   :  { %3028 = vmatprep.mubr.bf16.mxu0 %v1062_v23  ;;  %1437 = vmatprep.subr.bf16.mxu0 %v3253_v45  ;;  %v3265_v23 = vld [vmem:[#allocation2 + $0x2f4] ss:$8 sps:$4 sm:$0xff]  }
 0x497   :  { %3029 = vmatmul.mubr.bf16.gmra.mrb[56].mxu0 %v1063_v63  ;;  %v3260_v63 = vld [vmem:[#allocation2 + $0x2e0] ss:$8 sps:$4 sm:$0xff]  }
 0x499   :  { %1438 = vmatpush1.bf16.msra.mxu0 %v3251_v48 }
 0x49a   :  { %1439 = vmatprep.subr.bf16.mxu0 %v3256_v18 }
 0x49c   :  { %v3002_v4 = vpop.f32.mrb[44].mxu1 }
 0x49d   :  { %v1020_v8 = vadd.f32 %v3002_v4, %v880_v50  ;;  %v1011_v9 = vpop.f32.mrb[45].mxu1  ;;  %1440 = vmatpush1.bf16.msra.mxu0 %v3254_v19  ;;  %v3263_v4 = vld [vmem:[#allocation2 + $0x2f0] ss:$8 sps:$4 sm:$0xff]  }
 0x49e   :  { %v1012_v36 = vadd.f32 %v1011_v9, %v880_v50  ;;  %v3003_v58 = vpop.f32.mrb[46].mxu1  ;;  %v3266_v9 = vld [vmem:[#allocation2 + $0x300] ss:$8 sps:$4 sm:$0xff]  }
 0x49f   :  { %v1023_v6 = vadd.f32 %v3003_v58, %v880_v50  ;;  %v1014_v12 = vpop.f32.mrb[47].mxu1  ;;  %v1040_v33 = vmax.f32 %v1020_v8, 0.0  ;;  %v3268_v8 = vld [vmem:[#allocation2 + $0x304] ss:$8 sps:$4 sm:$0xff]   ;;  %v3269_v58 = vld [vmem:[#allocation2 + $0x3a0] ss:$8 sps:$4 sm:$0xff]  }
 0x4a0   :  { %v1015_v14 = vadd.f32 %v1014_v12, %v880_v50  ;;  %v1038_v26 = vmax.f32 %v1012_v36, 0.0  ;;  %v3242_v50 = vld [vmem:[#allocation2 + $0x310] ss:$8 sps:$4 sm:$0xff]   ;;  %v1270_v36 = vld [vmem:[%s3987_s1] sm:$0x1] }
 0x4a1   :  { %v1041_v43 = vmax.f32 %v1023_v6, 0.0  ;;  %1305 = vmatpush1.bf16.msra.mxu1 %v3242_v50  ;;  %v3270_v6 = vld [vmem:[#allocation2 + $0x320] ss:$8 sps:$4 sm:$0xff]   ;;  %v3271_v12 = vld [vmem:[#allocation2 + $0x3b0] ss:$8 sps:$4 sm:$0xff]  }
 0x4a2   :  { %v1039_v49 = vmax.f32 %v1015_v14, 0.0  ;;  %2781 = vmatprep.subr.bf16.mxu1 %v3269_v58  ;;  %v3272_v14 = vld [vmem:[#allocation2 + $0x330] ss:$8 sps:$4 sm:$0xff]  }
 0x4a3   :  { %v1065_v51 = vpack.c.bf16 %v1041_v43, %v1040_v33  ;;  %v3273_v33 = vld [vmem:[#allocation2 + $0x3c0] ss:$8 sps:$4 sm:$0xff]  }
 0x4a4   :  { %v1064_v1 = vpack.c.bf16 %v1039_v49, %v1038_v26  ;;  %2627 = vmatmul.mubr.msk.bf16.vlgmr.msra.gmra.mrb[48].mxu1 %vm112_vm0, %v1270_v36  ;;  %v3274_v43 = vld [vmem:[#allocation2 + $0x340] ss:$8 sps:$4 sm:$0xff]   ;;  %v3275_v26 = vld [vmem:[#allocation2 + $0x3d0] ss:$8 sps:$4 sm:$0xff]  }
 0x4a5   :  { %2782 = vmatpush3.bf16.msra.mxu1 %v3270_v6  ;;  %v3276_v49 = vld [vmem:[#allocation2 + $0x350] ss:$8 sps:$4 sm:$0xff]  }
 0x4a6   :  { %3032 = vmatprep.mubr.bf16.mxu0 %v1064_v1  ;;  %2783 = vmatprep.subr.bf16.mxu1 %v3271_v12  ;;  %v3278_v1 = vld [vmem:[#allocation2 + $0x360] ss:$8 sps:$4 sm:$0xff]  }
 0x4a7   :  { %3033 = vmatmul.mubr.bf16.gmra.mrb[60].mxu0 %v1065_v51  ;;  %v3277_v51 = vld [vmem:[#allocation2 + $0x3e0] ss:$8 sps:$4 sm:$0xff]  }
 0x4a8   :  { %1465 = vmatprep.mubr.bf16.mxu0 %v3352_v0  ;;  %v3259_v0 = vld [vmem:[#allocation2 + $0x2d4] ss:$8 sps:$4 sm:$0xff]  }
 0x4a9   :  { %1441 = vmatprep.subr.bf16.mxu0 %v3259_v0  ;;  %2784 = vmatpush3.bf16.msra.mxu1 %v3272_v14 }
 0x4aa   :  { %1442 = vmatpush1.bf16.msra.mxu0 %v3257_v20  ;;  %2785 = vmatprep.subr.bf16.mxu1 %v3273_v33 }
 0x4ab   :  { %1443 = vmatprep.subr.bf16.mxu0 %v3262_v29 }
 0x4ad   :  { %2786 = vmatpush3.bf16.msra.mxu1 %v3274_v43 }
 0x4ae   :  { %1444 = vmatpush1.bf16.msra.mxu0 %v3260_v63  ;;  %2787 = vmatprep.subr.bf16.mxu1 %v3275_v26 }
 0x4af   :  { %1445 = vmatprep.subr.bf16.mxu0 %v3265_v23 }
 0x4b1   :  { %2788 = vmatpush3.bf16.msra.mxu1 %v3276_v49 }
 0x4b2   :  { %1446 = vmatpush1.bf16.msra.mxu0 %v3263_v4  ;;  %2789 = vmatprep.subr.bf16.mxu1 %v3277_v51 }
 0x4b3   :  { %1447 = vmatprep.subr.bf16.mxu0 %v3268_v8 }
 0x4b5   :  { %2790 = vmatpush3.bf16.msra.mxu1 %v3278_v1 }
 0x4b6   :  { %1448 = vmatpush1.bf16.msra.mxu0 %v3266_v9 }
 0x54a   :  { %v3022_v35 = vpop.f32.mrb[48].mxu0 }
 0x54b   :  { %v1158_v44 = vadd.f32 %v3022_v35, %v3782_v13  ;;  %v1149_v46 = vpop.f32.mrb[49].mxu0 }
 0x54c   :  { %v1150_v45 = vadd.f32 %v1149_v46, %v3782_v13  ;;  %v3023_v50 = vpop.f32.mrb[50].mxu0 }
 0x54d   :  { %v1214_v47 = vadd.f32 %v1158_v44, %v842_v54  ;;  %v1161_v48 = vadd.f32 %v3023_v50, %v3782_v13  ;;  %v1152_v18 = vpop.f32.mrb[51].mxu0 }
 0x54e   :  { %v1212_v19 = vadd.f32 %v1150_v45, %v840_v10  ;;  %v1153_v0 = vadd.f32 %v1152_v18, %v3782_v13  ;;  %v3279_v18 = vld [vmem:[#allocation2 + $0x3f0] ss:$8 sps:$4 sm:$0xff]  }
 0x54f   :  { %v1230_v20 = vmax.f32 %v1214_v47, 0.0  ;;  %v1215_v29 = vadd.f32 %v1161_v48, %v843_v53  ;;  %2791 = vmatprep.subr.bf16.mxu1 %v3279_v18 }
 0x550   :  { %v1228_v63 = vmax.f32 %v1212_v19, 0.0  ;;  %v1213_v23 = vadd.f32 %v1153_v0, %v841_v39 }
 0x551   :  { %v1231_v4 = vmax.f32 %v1215_v29, 0.0 }
 0x552   :  { %v1244_v8 = vmax.f32 %v1228_v63, %v1230_v20  ;;  %v1229_v59 = vmax.f32 %v1213_v23, 0.0 }
 0x553   :  { %v3796_v54 = vpack.c.bf16 %v1231_v4, %v1230_v20  ;;  %v3280_v20 = vld [vmem:[#allocation2 + $0x370] ss:$8 sps:$4 sm:$0xff]  }
 0x554   :  { %v1245_v9 = vmax.f32 %v1229_v59, %v1231_v4  ;;  %v3798_v36 = vpack.c.bf16 %v1229_v59, %v1228_v63  ;;  %2792 = vmatpush3.bf16.msra.mxu1 %v3280_v20  ;;  %v3282_v20 = vld [vmem:[#allocation2 + $0x380] ss:$8 sps:$4 sm:$0xff]  }
 0x55a   :  { %v3026_v31 = vpop.f32.mrb[52].mxu0 }
 0x55b   :  { %v1174_v10 = vadd.f32 %v3026_v31, %v3782_v13  ;;  %v1165_v58 = vpop.f32.mrb[53].mxu0 }
 0x55c   :  { %v1166_v6 = vadd.f32 %v1165_v58, %v3782_v13  ;;  %v3027_v52 = vpop.f32.mrb[54].mxu0 }
 0x55d   :  { %v1218_v53 = vadd.f32 %v1174_v10, %v846_v62  ;;  %v1177_v24 = vadd.f32 %v3027_v52, %v3782_v13  ;;  %v1168_v39 = vpop.f32.mrb[55].mxu0 }
 0x55e   :  { %v1216_v12 = vadd.f32 %v1166_v6, %v844_v41  ;;  %v1169_v14 = vadd.f32 %v1168_v39, %v3782_v13 }
 0x55f   :  { %v1219_v33 = vadd.f32 %v1177_v24, %v847_v30  ;;  %v1234_v49 = vmax.f32 %v1218_v53, 0.0 }
 0x560   :  { %v1232_v43 = vmax.f32 %v1216_v12, 0.0  ;;  %v1217_v26 = vadd.f32 %v1169_v14, %v845_v60 }
 0x561   :  { %v1235_v51 = vmax.f32 %v1219_v33, 0.0 }
 0x562   :  { %v1246_v1 = vmax.f32 %v1244_v8, %v1232_v43  ;;  %v1233_v5 = vmax.f32 %v1217_v26, 0.0 }
 0x563   :  { %v3812_v62 = vpack.c.bf16 %v1235_v51, %v1234_v49 }
 0x564   :  { %v1248_v35 = vmax.f32 %v1246_v1, %v1234_v49  ;;  %v1247_v44 = vmax.f32 %v1245_v9, %v1233_v5  ;;  %v3814_v46 = vpack.c.bf16 %v1233_v5, %v1232_v43 }
 0x566   :  { %v1249_v2 = vmax.f32 %v1247_v44, %v1235_v51 }
 0x568   :  { %v1250_v41 = vmax.f32 %v1248_v35, %v1249_v2 }
 0x56a   :  { %v3030_v45 = vpop.f32.mrb[56].mxu0  ;;  %v1251_v34 = vrot.slane %v1250_v41, 4 }
 0x56b   :  { %v1190_v7 = vadd.f32 %v3030_v45, %v3782_v13  ;;  %v1181_v30 = vpop.f32.mrb[57].mxu0 }
 0x56c   :  { %v1182_v50 = vadd.f32 %v1181_v30, %v3782_v13  ;;  %v3031_v11 = vpop.f32.mrb[58].mxu0  ;;  %v1252_v39 = vmax.f32 %v1250_v41, %v1251_v34 }
 0x56d   :  { %v1222_v60 = vadd.f32 %v1190_v7, %v850_v57  ;;  %v1193_v47 = vadd.f32 %v3031_v11, %v3782_v13  ;;  %v1184_v48 = vpop.f32.mrb[59].mxu0 }
 0x56e   :  { %v1220_v19 = vadd.f32 %v1182_v50, %v848_v3  ;;  %v1185_v0 = vadd.f32 %v1184_v48, %v3782_v13  ;;  %v1253_v49 = vrot.slane %v1252_v39, 2 }
 0x56f   :  { %v1238_v29 = vmax.f32 %v1222_v60, 0.0  ;;  %v1223_v63 = vadd.f32 %v1193_v47, %v851_v38 }
 0x570   :  { %v1236_v23 = vmax.f32 %v1220_v19, 0.0  ;;  %v1221_v32 = vadd.f32 %v1185_v0, %v849_v16  ;;  %v1254_v1 = vmax.f32 %v1252_v39, %v1253_v49  ;;  %v3281_v0 = vld [vmem:[#allocation2 + $0x400] ss:$8 sps:$4 sm:$0xff]  }
 0x571   :  { %v1239_v57 = vmax.f32 %v1223_v63, 0.0  ;;  %2793 = vmatprep.subr.bf16.mxu1 %v3281_v0  ;;  %v3284_v63 = vld [vmem:[#allocation2 + $0x390] ss:$8 sps:$4 sm:$0xff]   ;;  %v3289_v49 = vld [vmem:[#allocation2 + $0x460] ss:$8 sps:$4 sm:$0xff]  }
 0x572   :  { %v1257_v4 = vmax.f32 %v1236_v23, %v1238_v29  ;;  %v1237_v8 = vmax.f32 %v1221_v32, 0.0  ;;  %v1255_v5 = vrot.slane %v1254_v1, 1  ;;  %2794 = vmatpush3.bf16.msra.mxu1 %v3282_v20  ;;  %v3293_v32 = vld [vmem:[#allocation2 + $0x4a0] ss:$8 sps:$4 sm:$0xff]  }
 0x573   :  { %v3828_v59 = vpack.c.bf16 %v1239_v57, %v1238_v29  ;;  %v3283_v29 = vld [vmem:[#allocation2 + $0x410] ss:$8 sps:$4 sm:$0xff]  }
 0x574   :  { %v1258_v28 = vmax.f32 %v1237_v8, %v1239_v57  ;;  %v3830_v3 = vpack.c.bf16 %v1237_v8, %v1236_v23  ;;  %v1256_v55 = vmax.f32 %v1254_v1, %v1255_v5  ;;  %2795 = vmatprep.subr.bf16.mxu1 %v3283_v29  ;;  %v3285_v23 = vld [vmem:[#allocation2 + $0x420] ss:$8 sps:$4 sm:$0xff]   ;;  %v3353_v57 = vmov 0.0   ;;  %v3300_v1 = vld [vmem:[#allocation2 + $0x510] ss:$8 sps:$4 sm:$0xff]  }
 0x575   :  { %3036 = vmatprep.subr.bf16.mxu0 %v3353_v57  ;;  %v3295_v8 = vld [vmem:[#allocation2 + $0x4c0] ss:$8 sps:$4 sm:$0xff]  }
 0x576   :  { %v1287_v41 = vpack.c.bf16 %v1256_v55, %v1256_v55  ;;  %2796 = vmatpush3.bf16.msra.mxu1 %v3284_v63  ;;  %v3304_v55 = vld [vmem:[#allocation2 + $0x550] ss:$8 sps:$4 sm:$0xff]   ;;  %v3305_v63 = vld [vmem:[#allocation2 + $0x560] ss:$8 sps:$4 sm:$0xff]  }
 0x577   :  { %v1338_v47 = vpop.f32.mrb[48].mxu1  ;;  %3056 = vmatprep.subr.bf16.mxu1 %v3285_v23 }
 0x578   :  { %v1347_v30 = vunpack.c.l.b16 %v1287_v41  ;;  %v1340_v48 = vpop.f32.mrb[49].mxu1 }
 0x579   :  { %v1342_v18 = vpop.f32.mrb[50].mxu1 }
 0x57a   :  { %v3034_v9 = vpop.f32.mrb[60].mxu0  ;;  %v1343_v19 = vpop.f32.mrb[51].mxu1 }
 0x57b   :  { %v1206_v31 = vadd.f32 %v3034_v9, %v3782_v13  ;;  %v1197_v10 = vpop.f32.mrb[61].mxu0  ;;  %v3297_v9 = vld [vmem:[#allocation2 + $0x4e0] ss:$8 sps:$4 sm:$0xff]  }
 0x57c   :  { %v1198_v38 = vadd.f32 %v1197_v10, %v3782_v13  ;;  %v3035_v58 = vpop.f32.mrb[62].mxu0  ;;  %v2644_v10 = vld [vmem:[%s3989_s3 + $0x6] ss:$8 sm:$0x3] }
 0x57d   :  { %v1226_v37 = vadd.f32 %v1206_v31, %v854_v25  ;;  %v1209_v16 = vadd.f32 %v3035_v58, %v3782_v13  ;;  %v1200_v6 = vpop.f32.mrb[63].mxu0  ;;  %v3298_v31 = vld [vmem:[#allocation2 + $0x4f0] ss:$8 sps:$4 sm:$0xff]   ;;  %v1480_v34 = vrot.slane %v2644_v10, %v3436_v22  ;;  %v1484_v58 = vrot.slane %v2644_v10, %v58_v56 }
 0x57e   :  { %v1224_v52 = vadd.f32 %v1198_v38, %v852_v40  ;;  %v1201_v53 = vadd.f32 %v1200_v6, %v3782_v13  ;;  %v3288_v56 = vld [vmem:[#allocation2 + $0x450] ss:$8 sps:$4 sm:$0xff]  }
 0x57f   :  { %v1227_v24 = vadd.f32 %v1209_v16, %v855_v61  ;;  %v1242_v33 = vmax.f32 %v1226_v37, 0.0  ;;  %v3314_v10 = vld [vmem:[#allocation2 + $0x5f0] ss:$8 sps:$4 sm:$0xff]  }
 0x580   :  { %v1240_v12 = vmax.f32 %v1224_v52, 0.0  ;;  %v1225_v14 = vadd.f32 %v1201_v53, %v853_v42 }
 0x581   :  { %v1243_v43 = vmax.f32 %v1227_v24, 0.0 }
 0x582   :  { %v1259_v15 = vmax.f32 %v1257_v4, %v1240_v12  ;;  %v1241_v25 = vmax.f32 %v1225_v14, 0.0  ;;  %v3294_v4 = vld [vmem:[#allocation2 + $0x4b0] ss:$8 sps:$4 sm:$0xff]  }
 0x583   :  { %v3844_v26 = vpack.c.bf16 %v1243_v43, %v1242_v33 }
 0x584   :  { %v1261_v51 = vmax.f32 %v1259_v15, %v1242_v33  ;;  %v1260_v27 = vmax.f32 %v1258_v28, %v1241_v25  ;;  %v3846_v40 = vpack.c.bf16 %v1241_v25, %v1240_v12  ;;  %v3296_v28 = vld [vmem:[#allocation2 + $0x4d0] ss:$8 sps:$4 sm:$0xff]   ;;  %v3287_v25 = vld [vmem:[#allocation2 + $0x440] ss:$8 sps:$4 sm:$0xff]  }
 0x585   :  { %v3286_v15 = vld [vmem:[#allocation2 + $0x430] ss:$8 sps:$4 sm:$0xff]  }
 0x586   :  { %v1262_v13 = vmax.f32 %v1260_v27, %v1243_v43  ;;  %v3291_v27 = vld [vmem:[#allocation2 + $0x480] ss:$8 sps:$4 sm:$0xff]  }
 0x588   :  { %v1263_v17 = vmax.f32 %v1261_v51, %v1262_v13  ;;  %v3290_v51 = vld [vmem:[#allocation2 + $0x470] ss:$8 sps:$4 sm:$0xff]  }
 0x589   :  { %v3292_v13 = vld [vmem:[#allocation2 + $0x490] ss:$8 sps:$4 sm:$0xff]  }
 0x58a   :  { %v1264_v61 = vrot.slane %v1263_v17, 4 }
 0x58c   :  { %v1265_v35 = vmax.f32 %v1263_v17, %v1264_v61 }
 0x58e   :  { %v1266_v44 = vrot.slane %v1265_v35, 2 }
 0x590   :  { %v1267_v42 = vmax.f32 %v1265_v35, %v1266_v44  ;;  %v3302_v35 = vld [vmem:[#allocation2 + $0x530] ss:$8 sps:$4 sm:$0xff]   ;;  %v3303_v44 = vld [vmem:[#allocation2 + $0x540] ss:$8 sps:$4 sm:$0xff]  }
 0x592   :  { %v1268_v2 = vrot.slane %v1267_v42, 1 }
 0x594   :  { %v1269_v45 = vmax.f32 %v1267_v42, %v1268_v2 }
 0x596   :  { %v1288_v7 = vpack.c.bf16 %v1269_v45, %v1269_v45 }
 0x598   :  { %v1348_v50 = vunpack.c.l.b16 %v1288_v7 }
 0x59a   :  { %v1350_v11 = vsel %vm1349_vm1, %v1348_v50, %v1347_v30 }
 0x59b   :  { %v1351_v60 = vpack.c.b16 %v1350_v11, %v1350_v11 }
 0x59d   :  { %1466 = vmatmul.mubr.bf16.vlgmr.msra.gmra.mrb[64].mxu0 %v1351_v60 }
 0x59e   :  { %3037 = vmatpush3.bf16.msra.mxu0 %v3293_v32  ;;  %3052 = vmatprep.mubr.msk.bf16.mxu0 %vm3354_vm2, %v3353_v57  ;;  %v3307_v32 = vld [vmem:[#allocation2 + $0x580] ss:$8 sps:$4 sm:$0xff]  }
 0x59f   :  { %3038 = vmatprep.subr.bf16.mxu0 %v3353_v57 }
 0x5a2   :  { %3039 = vmatpush3.bf16.msra.mxu0 %v3294_v4  ;;  %v3309_v4 = vld [vmem:[#allocation2 + $0x5a0] ss:$8 sps:$4 sm:$0xff]  }
 0x5a3   :  { %3040 = vmatprep.subr.bf16.mxu0 %v3353_v57 }
 0x5a6   :  { %3041 = vmatpush3.bf16.msra.mxu0 %v3295_v8  ;;  %v3310_v8 = vld [vmem:[#allocation2 + $0x5b0] ss:$8 sps:$4 sm:$0xff]  }
 0x5a7   :  { %3042 = vmatprep.subr.bf16.mxu0 %v3353_v57 }
 0x5aa   :  { %3043 = vmatpush3.bf16.msra.mxu0 %v3296_v28  ;;  %v3311_v28 = vld [vmem:[#allocation2 + $0x5c0] ss:$8 sps:$4 sm:$0xff]  }
 0x5ab   :  { %3044 = vmatprep.subr.bf16.mxu0 %v3353_v57 }
 0x5ae   :  { %3045 = vmatpush3.bf16.msra.mxu0 %v3297_v9  ;;  %v3312_v9 = vld [vmem:[#allocation2 + $0x5d0] ss:$8 sps:$4 sm:$0xff]  }
 0x5af   :  { %3046 = vmatprep.subr.bf16.mxu0 %v3353_v57 }
 0x5b2   :  { %3047 = vmatpush3.bf16.msra.mxu0 %v3298_v31  ;;  %v3313_v31 = vld [vmem:[#allocation2 + $0x5e0] ss:$8 sps:$4 sm:$0xff]  }
 0x5b3   :  { %3048 = vmatprep.subr.bf16.mxu0 %v3353_v57 }
 0x670   :  { %v1467_v38 = vpop.f32.mrb[64].mxu0 }
 0x671   :  { %v1468_v37 = vadd.f32 %v1467_v38, %v1338_v47  ;;  %v1469_v16 = vpop.f32.mrb[65].mxu0 }
 0x672   :  { %v1470_v6 = vadd.f32 %v1469_v16, %v1340_v48  ;;  %v1471_v52 = vpop.f32.mrb[66].mxu0 }
 0x673   :  { %v1487_v53 = vadd.f32 %v1480_v34, %v1468_v37  ;;  %v1472_v24 = vpop.f32.mrb[67].mxu0  ;;  %v3355_v34 = vmov 1966171168  }
 0x674   :  { %v1488_v39 = vadd.f32 %v1484_v58, %v1470_v6  ;;  %v1770_v38 = vunpack.c.l.s4 %v3355_v34 }
 0x675   :  { %v1489_v12 = vmax.f32 %v1487_v53, 0.0 }
 0x676   :  { %v1490_v14 = vmax.f32 %v1488_v39, 0.0  ;;  %v1771_v58 = vunpack.c.0.s8 %v1770_v38 }
 0x677   :  { %v1523_v43 = vpack.c.bf16 %v1489_v12, %v1489_v12 }
 0x678   :  { %v1524_v33 = vpack.c.bf16 %v1490_v14, %v1490_v14  ;;  %v1774_v37 = vsub.s32 %v1771_v58, %v3433_v21 }
 0x67a   :  { %1654 = vmatprep.mubr.bf16.mxu1 %v1524_v33 }
 0x67b   :  { %1655 = vmatmul.mubr.bf16.vlgmr.msra.gmra.mrb[52].mxu1 %v1523_v43  ;;  %v1970_v43 = vld [vmem:[%s3989_s3 + $0x10] ss:$0 sm:$0xff] }
 0x67c   :  { %3057 = vmatpush3.bf16.msra.mxu1 %v3285_v23  ;;  %3072 = vmatprep.mubr.bf16.mxu1 %v3798_v36  ;;  %v3299_v36 = vld [vmem:[#allocation2 + $0x500] ss:$8 sps:$4 sm:$0xff]   ;;  %v3306_v23 = vld [vmem:[#allocation2 + $0x570] ss:$8 sps:$4 sm:$0xff]  }
 0x67d   :  { %3058 = vmatprep.subr.bf16.mxu1 %v3286_v15  ;;  %3049 = vmatpush3.bf16.msra.mxu0 %v3299_v36 }
 0x67e   :  { %3050 = vmatprep.subr.bf16.mxu0 %v3353_v57  ;;  %v3308_v57 = vld [vmem:[#allocation2 + $0x590] ss:$8 sps:$4 sm:$0xff]  }
 0x680   :  { %3059 = vmatpush3.bf16.msra.mxu1 %v3286_v15 }
 0x681   :  { %3060 = vmatprep.subr.bf16.mxu1 %v3287_v25  ;;  %3051 = vmatpush3.bf16.msra.mxu0 %v3300_v1 }
 0x684   :  { %3061 = vmatpush3.bf16.msra.mxu1 %v3287_v25 }
 0x685   :  { %3062 = vmatprep.subr.bf16.mxu1 %v3288_v56 }
 0x688   :  { %3063 = vmatpush3.bf16.msra.mxu1 %v3288_v56 }
 0x689   :  { %3064 = vmatprep.subr.bf16.mxu1 %v3289_v49 }
 0x68c   :  { %3065 = vmatpush3.bf16.msra.mxu1 %v3289_v49 }
 0x68d   :  { %3066 = vmatprep.subr.bf16.mxu1 %v3290_v51 }
 0x690   :  { %3067 = vmatpush3.bf16.msra.mxu1 %v3290_v51 }
 0x691   :  { %3068 = vmatprep.subr.bf16.mxu1 %v3291_v27 }
 0x694   :  { %3069 = vmatpush3.bf16.msra.mxu1 %v3291_v27 }
 0x695   :  { %3070 = vmatprep.subr.bf16.mxu1 %v3292_v13 }
 0x698   :  { %3071 = vmatpush3.bf16.msra.mxu1 %v3292_v13 }
 0x699   :  { %3120 = vmatprep.subr.bf16.mxu1 %v3309_v4 }
 0x69b   :  { %3073 = vmatmul.mubr.bf16.vlgmr.msra.gmra.mrb[56].mxu1 %v3796_v54  ;;  %v3301_v54 = vld [vmem:[#allocation2 + $0x520] ss:$8 sps:$4 sm:$0xff]  }
 0x69c   :  { %3076 = vmatprep.mubr.bf16.mxu1 %v3814_v46  ;;  %3088 = vmatprep.subr.bf16.mxu0 %v3301_v54  ;;  %v1525_v46 = vld [vmem:[%s3989_s3 + $0x7] ss:$0 sm:$0xff] }
 0x69d   :  { %3121 = vmatpush3.bf16.msra.mxu1 %v3309_v4 }
 0x69e   :  { %3122 = vmatprep.subr.bf16.mxu1 %v3310_v8 }
 0x6a1   :  { %3123 = vmatpush3.bf16.msra.mxu1 %v3310_v8 }
 0x6a2   :  { %3124 = vmatprep.subr.bf16.mxu1 %v3311_v28 }
 0x6a3   :  { %3077 = vmatmul.mubr.bf16.gmra.mrb[60].mxu1 %v3812_v62 }
 0x6a4   :  { %3080 = vmatprep.mubr.bf16.mxu1 %v3830_v3 }
 0x6a5   :  { %3125 = vmatpush3.bf16.msra.mxu1 %v3311_v28 }
 0x6a6   :  { %3126 = vmatprep.subr.bf16.mxu1 %v3312_v9 }
 0x6a9   :  { %3127 = vmatpush3.bf16.msra.mxu1 %v3312_v9 }
 0x6aa   :  { %3128 = vmatprep.subr.bf16.mxu1 %v3313_v31 }
 0x6ab   :  { %3081 = vmatmul.mubr.bf16.gmra.mrb[64].mxu1 %v3828_v59 }
 0x6ac   :  { %3084 = vmatprep.mubr.bf16.mxu1 %v3846_v40 }
 0x6ad   :  { %3129 = vmatpush3.bf16.msra.mxu1 %v3313_v31 }
 0x6ae   :  { %3130 = vmatprep.subr.bf16.mxu1 %v3314_v10 }
 0x6b1   :  { %3131 = vmatpush3.bf16.msra.mxu1 %v3314_v10 }
 0x6b3   :  { %3085 = vmatmul.mubr.bf16.gmra.mrb[68].mxu1 %v3844_v26 }
 0x74e   :  { %v2797_v62 = vpop.f32.mrb[52].mxu1 }
 0x74f   :  { %v2798_v59 = vpop.f32.mrb[53].mxu1 }
 0x750   :  { %v2799_v3 = vadd.f32 %v2798_v59, %v2797_v62  ;;  %v2800_v40 = vpop.f32.mrb[54].mxu1 }
 0x751   :  { %v2801_v26 = vpop.f32.mrb[55].mxu1 }
 0x752   :  { %v1657_v17 = vadd.f32 %v2799_v3, %v1525_v46 }
 0x754   :  { %v1662_v61 = vmax.f32 %v1657_v17, 0.0 }
 0x756   :  { %v1679_v5 = vpack.c.bf16 %v1662_v61, %v1662_v61 }
 0x758   :  { %3053 = vmatmul.mubr.bf16.vlgmr.msra.gmra.mrb[68].mxu0 %v1679_v5 }
 0x759   :  { %3089 = vmatpush3.bf16.msra.mxu0 %v3301_v54 }
 0x75a   :  { %3090 = vmatprep.subr.bf16.mxu0 %v3302_v35 }
 0x75d   :  { %3091 = vmatpush3.bf16.msra.mxu0 %v3302_v35 }
 0x75e   :  { %3092 = vmatprep.subr.bf16.mxu0 %v3303_v44 }
 0x761   :  { %3093 = vmatpush3.bf16.msra.mxu0 %v3303_v44 }
 0x762   :  { %3094 = vmatprep.subr.bf16.mxu0 %v3304_v55 }
 0x765   :  { %3095 = vmatpush3.bf16.msra.mxu0 %v3304_v55 }
 0x766   :  { %3096 = vmatprep.subr.bf16.mxu0 %v3305_v63 }
 0x769   :  { %3097 = vmatpush3.bf16.msra.mxu0 %v3305_v63 }
 0x76a   :  { %3098 = vmatprep.subr.bf16.mxu0 %v3306_v23 }
 0x76d   :  { %3099 = vmatpush3.bf16.msra.mxu0 %v3306_v23 }
 0x76e   :  { %v3874_v42 = vpop.f32.mrb[56].mxu1  ;;  %3100 = vmatprep.subr.bf16.mxu0 %v3307_v32 }
 0x76f   :  { %v1907_v2 = vpop.f32.mrb[57].mxu1 }
 0x770   :  { %v3075_v41 = vpop.f32.mrb[58].mxu1 }
 0x771   :  { %v1910_v45 = vpop.f32.mrb[59].mxu1  ;;  %3101 = vmatpush3.bf16.msra.mxu0 %v3307_v32 }
 0x772   :  { %3102 = vmatprep.subr.bf16.mxu0 %v3308_v57 }
 0x775   :  { %3103 = vmatpush3.bf16.msra.mxu0 %v3308_v57 }
 0x776   :  { %v3876_v7 = vpop.f32.mrb[60].mxu1 }
 0x777   :  { %v1923_v30 = vpop.f32.mrb[61].mxu1 }
 0x778   :  { %v3878_v50 = vpop.f32.mrb[62].mxu1 }
 0x779   :  { %v1926_v11 = vpop.f32.mrb[63].mxu1 }
 0x77e   :  { %v3880_v60 = vpop.f32.mrb[64].mxu1 }
 0x77f   :  { %v3882_v47 = vpop.f32.mrb[65].mxu1 }
 0x780   :  { %v3884_v48 = vpop.f32.mrb[66].mxu1 }
 0x781   :  { %v3886_v18 = vpop.f32.mrb[67].mxu1 }
 0x786   :  { %v3888_v19 = vpop.f32.mrb[68].mxu1 }
 0x787   :  { %v3890_v0 = vpop.f32.mrb[69].mxu1 }
 0x788   :  { %v3892_v20 = vpop.f32.mrb[70].mxu1 }
 0x789   :  { %v3894_v29 = vpop.f32.mrb[71].mxu1 }
 0x82b   :  { %v1762_v16 = vpop.f32.mrb[68].mxu0 }
 0x82c   :  { %v1775_v6 = vrot.slane %v1762_v16, %v1774_v37  ;;  %v3054_v52 = vpop.f32.mrb[69].mxu0 }
 0x82d   :  { %v1765_v53 = vpop.f32.mrb[70].mxu0 }
 0x82e   :  { %v1776_v24 = vcombine.high %v1775_v6, %v1775_v6  ;;  %v1783_v39 = vrot.slane %v1775_v6, %v1774_v37  ;;  %v3055_v12 = vpop.f32.mrb[71].mxu0 }
 0x82f   :  { %v3318_v12 = vld [vmem:[#allocation2 + $0x630] ss:$8 sps:$4 sm:$0xff]  }
 0x830   :  { %v1790_v14 = vrot.slane %v1776_v24, %v1774_v37  ;;  %v1794_v33 = vrot.slane %v1783_v39, %v3436_v22  ;;  %v3317_v39 = vld [vmem:[#allocation2 + $0x620] ss:$8 sps:$4 sm:$0xff]  }
 0x831   :  { %3152 = vmatprep.subr.bf16.mxu0 %v3317_v39 }
 0x832   :  { %v1798_v15 = vrot.slane %v1790_v14, %v3436_v22  ;;  %v1908_v25 = vadd.f32 %v1907_v2, %v1794_v33  ;;  %v1911_v56 = vadd.f32 %v1910_v45, %v1794_v33  ;;  %v1916_v21 = vadd.f32 %v3874_v42, %v1794_v33  ;;  %v3319_v14 = vld [vmem:[#allocation2 + $0x640] ss:$8 sps:$4 sm:$0xff]  }
 0x833   :  { %v1919_v49 = vadd.f32 %v3075_v41, %v1794_v33  ;;  %v1924_v51 = vadd.f32 %v1923_v30, %v1794_v33  ;;  %v1927_v27 = vadd.f32 %v1926_v11, %v1794_v33  ;;  %v1932_v13 = vadd.f32 %v3876_v7, %v1794_v33 }
 0x834   :  { %v1971_v36 = vadd.f32 %v1970_v43, %v1908_v25  ;;  %v1972_v1 = vadd.f32 %v1970_v43, %v1911_v56  ;;  %v1973_v54 = vadd.f32 %v1970_v43, %v1916_v21  ;;  %v1935_v62 = vadd.f32 %v3878_v50, %v1794_v33  ;;  %v3320_v33 = vld [vmem:[#allocation2 + $0x650] ss:$8 sps:$4 sm:$0xff]  }
 0x835   :  { %v1974_v46 = vadd.f32 %v1970_v43, %v1919_v49  ;;  %v1975_v59 = vadd.f32 %v1970_v43, %v1924_v51  ;;  %v1976_v3 = vadd.f32 %v1970_v43, %v1927_v27  ;;  %v1977_v40 = vadd.f32 %v1970_v43, %v1932_v13  ;;  %v2027_v25 = vld [vmem:[%s3989_s3 + $0x11] ss:$0 sm:$0xff] }
 0x836   :  { %v1987_v26 = vmax.f32 %v1971_v36, 0.0  ;;  %v1988_v22 = vmax.f32 %v1972_v1, 0.0  ;;  %v1989_v17 = vmax.f32 %v1973_v54, 0.0  ;;  %v1978_v61 = vadd.f32 %v1970_v43, %v1935_v62 }
 0x837   :  { %v1990_v5 = vmax.f32 %v1974_v46, 0.0  ;;  %v1991_v35 = vmax.f32 %v1975_v59, 0.0  ;;  %v1992_v44 = vmax.f32 %v1976_v3, 0.0  ;;  %v1993_v55 = vmax.f32 %v1977_v40, 0.0 }
 0x838   :  { %v2019_v42 = vpack.c.bf16 %v1988_v22, %v1987_v26  ;;  %v1994_v2 = vmax.f32 %v1978_v61, 0.0  ;;  %v1940_v41 = vadd.f32 %v3882_v47, %v1798_v15  ;;  %v1943_v45 = vadd.f32 %v3886_v18, %v1798_v15 }
 0x839   :  { %v2020_v7 = vpack.c.bf16 %v1990_v5, %v1989_v17  ;;  %v2021_v30 = vpack.c.bf16 %v1992_v44, %v1991_v35  ;;  %v1948_v50 = vadd.f32 %v3880_v60, %v1798_v15  ;;  %v1951_v11 = vadd.f32 %v3884_v48, %v1798_v15 }
 0x83a   :  { %3104 = vmatprep.mubr.bf16.mxu0 %v2019_v42  ;;  %v2022_v63 = vpack.c.bf16 %v1994_v2, %v1993_v55  ;;  %v1979_v23 = vadd.f32 %v1970_v43, %v1940_v41  ;;  %v1980_v32 = vadd.f32 %v1970_v43, %v1943_v45  ;;  %v1956_v57 = vadd.f32 %v3890_v0, %v1798_v15 }
 0x83b   :  { %3105 = vmatmul.mubr.bf16.vlgmr.msra.gmra.mrb[72].mxu0 %v2020_v7  ;;  %v1981_v4 = vadd.f32 %v1970_v43, %v1948_v50  ;;  %v1982_v8 = vadd.f32 %v1970_v43, %v1951_v11  ;;  %v1959_v28 = vadd.f32 %v3894_v29, %v1798_v15  ;;  %v1964_v47 = vadd.f32 %v3888_v19, %v1798_v15  ;;  %v3315_v19 = vld [vmem:[#allocation2 + $0x600] ss:$8 sps:$4 sm:$0xff]  }
 0x83c   :  { %3108 = vmatprep.mubr.bf16.mxu0 %v2021_v30  ;;  %v1995_v18 = vmax.f32 %v1979_v23, 0.0  ;;  %v1996_v9 = vmax.f32 %v1980_v32, 0.0  ;;  %v1983_v31 = vadd.f32 %v1970_v43, %v1956_v57  ;;  %v1967_v60 = vadd.f32 %v3892_v20, %v1798_v15  ;;  %v3316_v20 = vld [vmem:[#allocation2 + $0x610] ss:$8 sps:$4 sm:$0xff]   ;;  %3132 = vmatprep.subr.bf16.mxu1 %v3315_v19 }
 0x83d   :  { %v1997_v48 = vmax.f32 %v1981_v4, 0.0  ;;  %v1998_v10 = vmax.f32 %v1982_v8, 0.0  ;;  %v1984_v34 = vadd.f32 %v1970_v43, %v1959_v28  ;;  %v1985_v38 = vadd.f32 %v1970_v43, %v1964_v47  ;;  %3133 = vmatpush3.bf16.msra.mxu1 %v3315_v19  ;;  %3153 = vmatpush3.bf16.msra.mxu0 %v3317_v39  ;;  %v3322_v15 = vld [vmem:[#allocation2 + $0x670] ss:$8 sps:$4 sm:$0xff]  }
 0x83e   :  { %v2023_v58 = vpack.c.bf16 %v1996_v9, %v1995_v18  ;;  %v1999_v37 = vmax.f32 %v1983_v31, 0.0  ;;  %v1986_v0 = vadd.f32 %v1970_v43, %v1967_v60  ;;  %3134 = vmatprep.subr.bf16.mxu1 %v3316_v20  ;;  %3154 = vmatprep.subr.bf16.mxu0 %v3318_v12  ;;  %v3321_v43 = vld [vmem:[#allocation2 + $0x660] ss:$8 sps:$4 sm:$0xff]   ;;  %v3324_v39 = vld [vmem:[#allocation2 + $0x690] ss:$8 sps:$4 sm:$0xff]  }
 0x83f   :  { %v2024_v16 = vpack.c.bf16 %v1998_v10, %v1997_v48  ;;  %v2000_v6 = vmax.f32 %v1984_v34, 0.0  ;;  %v2001_v52 = vmax.f32 %v1985_v38, 0.0 }
 0x840   :  { %v2002_v53 = vmax.f32 %v1986_v0, 0.0 }
 0x841   :  { %v2025_v29 = vpack.c.bf16 %v2000_v6, %v1999_v37  ;;  %3135 = vmatpush3.bf16.msra.mxu1 %v3316_v20  ;;  %3155 = vmatpush3.bf16.msra.mxu0 %v3318_v12  ;;  %v3323_v20 = vld [vmem:[#allocation2 + $0x680] ss:$8 sps:$4 sm:$0xff]   ;;  %v2213_v12 = vld [vmem:[%s3989_s3 + $0x12] ss:$0 sm:$0xff] }
 0x842   :  { %v2026_v24 = vpack.c.bf16 %v2002_v53, %v2001_v52  ;;  %3156 = vmatprep.subr.bf16.mxu0 %v3319_v14 }
 0x843   :  { %3109 = vmatmul.mubr.bf16.gmra.mrb[76].mxu0 %v2022_v63 }
 0x844   :  { %3112 = vmatprep.mubr.bf16.mxu0 %v2023_v58 }
 0x845   :  { %3157 = vmatpush3.bf16.msra.mxu0 %v3319_v14 }
 0x846   :  { %3158 = vmatprep.subr.bf16.mxu0 %v3320_v33 }
 0x849   :  { %3159 = vmatpush3.bf16.msra.mxu0 %v3320_v33 }
 0x84a   :  { %3160 = vmatprep.subr.bf16.mxu0 %v3321_v43 }
 0x84b   :  { %3113 = vmatmul.mubr.bf16.gmra.mrb[80].mxu0 %v2024_v16 }
 0x84c   :  { %3116 = vmatprep.mubr.bf16.mxu0 %v2025_v29 }
 0x84d   :  { %3161 = vmatpush3.bf16.msra.mxu0 %v3321_v43 }
 0x84e   :  { %3162 = vmatprep.subr.bf16.mxu0 %v3322_v15 }
 0x851   :  { %3163 = vmatpush3.bf16.msra.mxu0 %v3322_v15 }
 0x852   :  { %3164 = vmatprep.subr.bf16.mxu0 %v3323_v20 }
 0x853   :  { %3117 = vmatmul.mubr.bf16.gmra.mrb[84].mxu0 %v2026_v24 }
 0x855   :  { %3165 = vmatpush3.bf16.msra.mxu0 %v3323_v20 }
 0x856   :  { %3166 = vmatprep.subr.bf16.mxu0 %v3324_v39 }
 0x859   :  { %3167 = vmatpush3.bf16.msra.mxu0 %v3324_v39 }
 0x90e   :  { %v3106_v56 = vpop.f32.mrb[72].mxu0 }
 0x90f   :  { %v2119_v21 = vadd.f32 %v3106_v56, %v2027_v25  ;;  %v2110_v49 = vpop.f32.mrb[73].mxu0 }
 0x910   :  { %v2111_v51 = vadd.f32 %v2110_v49, %v2027_v25  ;;  %v3107_v27 = vpop.f32.mrb[74].mxu0 }
 0x911   :  { %v2122_v13 = vadd.f32 %v3107_v27, %v2027_v25  ;;  %v2113_v36 = vpop.f32.mrb[75].mxu0  ;;  %v2175_v54 = vmax.f32 %v2119_v21, 0.0 }
 0x912   :  { %v2114_v1 = vadd.f32 %v2113_v36, %v2027_v25  ;;  %v2173_v46 = vmax.f32 %v2111_v51, 0.0 }
 0x913   :  { %v2176_v62 = vmax.f32 %v2122_v13, 0.0 }
 0x914   :  { %v2174_v59 = vmax.f32 %v2114_v1, 0.0 }
 0x915   :  { %v2206_v3 = vpack.c.bf16 %v2176_v62, %v2175_v54 }
 0x916   :  { %v2205_v40 = vpack.c.bf16 %v2174_v59, %v2173_v46  ;;  %v3110_v26 = vpop.f32.mrb[76].mxu0 }
 0x917   :  { %v2135_v22 = vadd.f32 %v3110_v26, %v2027_v25  ;;  %v2126_v17 = vpop.f32.mrb[77].mxu0 }
 0x918   :  { %v2127_v61 = vadd.f32 %v2126_v17, %v2027_v25  ;;  %v3111_v5 = vpop.f32.mrb[78].mxu0  ;;  %3136 = vmatprep.mubr.bf16.mxu1 %v2205_v40 }
 0x919   :  { %v2138_v35 = vadd.f32 %v3111_v5, %v2027_v25  ;;  %v2129_v44 = vpop.f32.mrb[79].mxu0  ;;  %3137 = vmatmul.mubr.bf16.vlgmr.msra.gmra.mrb[72].mxu1 %v2206_v3  ;;  %v2179_v42 = vmax.f32 %v2135_v22, 0.0 }
 0x91a   :  { %v2130_v55 = vadd.f32 %v2129_v44, %v2027_v25  ;;  %v2177_v41 = vmax.f32 %v2127_v61, 0.0 }
 0x91b   :  { %v2180_v2 = vmax.f32 %v2138_v35, 0.0 }
 0x91c   :  { %v2178_v45 = vmax.f32 %v2130_v55, 0.0 }
 0x91d   :  { %v2208_v7 = vpack.c.bf16 %v2180_v2, %v2179_v42 }
 0x91e   :  { %v2207_v30 = vpack.c.bf16 %v2178_v45, %v2177_v41  ;;  %v3114_v50 = vpop.f32.mrb[80].mxu0 }
 0x91f   :  { %v2151_v11 = vadd.f32 %v3114_v50, %v2027_v25  ;;  %v2142_v63 = vpop.f32.mrb[81].mxu0 }
 0x920   :  { %v2143_v23 = vadd.f32 %v2142_v63, %v2027_v25  ;;  %v3115_v32 = vpop.f32.mrb[82].mxu0  ;;  %3140 = vmatprep.mubr.bf16.mxu1 %v2207_v30 }
 0x921   :  { %v2154_v57 = vadd.f32 %v3115_v32, %v2027_v25  ;;  %v2145_v4 = vpop.f32.mrb[83].mxu0  ;;  %3141 = vmatmul.mubr.bf16.gmra.mrb[76].mxu1 %v2208_v7  ;;  %v2183_v28 = vmax.f32 %v2151_v11, 0.0 }
 0x922   :  { %v2146_v8 = vadd.f32 %v2145_v4, %v2027_v25  ;;  %v2181_v18 = vmax.f32 %v2143_v23, 0.0 }
 0x923   :  { %v2184_v47 = vmax.f32 %v2154_v57, 0.0 }
 0x924   :  { %v2182_v9 = vmax.f32 %v2146_v8, 0.0 }
 0x925   :  { %v2210_v31 = vpack.c.bf16 %v2184_v47, %v2183_v28 }
 0x926   :  { %v2209_v60 = vpack.c.bf16 %v2182_v9, %v2181_v18  ;;  %v3118_v48 = vpop.f32.mrb[84].mxu0 }
 0x927   :  { %v2167_v10 = vadd.f32 %v3118_v48, %v2027_v25  ;;  %v2158_v34 = vpop.f32.mrb[85].mxu0 }
 0x928   :  { %v2159_v38 = vadd.f32 %v2158_v34, %v2027_v25  ;;  %v3119_v58 = vpop.f32.mrb[86].mxu0  ;;  %3144 = vmatprep.mubr.bf16.mxu1 %v2209_v60 }
 0x929   :  { %v2170_v37 = vadd.f32 %v3119_v58, %v2027_v25  ;;  %v2161_v0 = vpop.f32.mrb[87].mxu0  ;;  %3145 = vmatmul.mubr.bf16.gmra.mrb[80].mxu1 %v2210_v31  ;;  %v2187_v6 = vmax.f32 %v2167_v10, 0.0 }
 0x92a   :  { %v2162_v16 = vadd.f32 %v2161_v0, %v2027_v25  ;;  %v2185_v53 = vmax.f32 %v2159_v38, 0.0 }
 0x92b   :  { %v2188_v52 = vmax.f32 %v2170_v37, 0.0 }
 0x92c   :  { %v2186_v29 = vmax.f32 %v2162_v16, 0.0 }
 0x92d   :  { %v2212_v24 = vpack.c.bf16 %v2188_v52, %v2187_v6  ;;  %v2399_v52 = vld [vmem:[%s3989_s3 + $0x13] ss:$0 sm:$0xff] }
 0x92e   :  { %v2211_v19 = vpack.c.bf16 %v2186_v29, %v2185_v53 }
 0x930   :  { %3148 = vmatprep.mubr.bf16.mxu1 %v2211_v19 }
 0x931   :  { %3149 = vmatmul.mubr.bf16.gmra.mrb[84].mxu1 %v2212_v24 }
 0x9ec   :  { %v3138_v14 = vpop.f32.mrb[72].mxu1 }
 0x9ed   :  { %v2305_v33 = vadd.f32 %v3138_v14, %v2213_v12  ;;  %v2296_v43 = vpop.f32.mrb[73].mxu1 }
 0x9ee   :  { %v2297_v15 = vadd.f32 %v2296_v43, %v2213_v12  ;;  %v3139_v25 = vpop.f32.mrb[74].mxu1 }
 0x9ef   :  { %v2308_v56 = vadd.f32 %v3139_v25, %v2213_v12  ;;  %v2299_v21 = vpop.f32.mrb[75].mxu1  ;;  %v2361_v51 = vmax.f32 %v2305_v33, 0.0 }
 0x9f0   :  { %v2300_v49 = vadd.f32 %v2299_v21, %v2213_v12  ;;  %v2359_v13 = vmax.f32 %v2297_v15, 0.0 }
 0x9f1   :  { %v2362_v27 = vmax.f32 %v2308_v56, 0.0 }
 0x9f2   :  { %v2360_v36 = vmax.f32 %v2300_v49, 0.0 }
 0x9f3   :  { %v2392_v1 = vpack.c.bf16 %v2362_v27, %v2361_v51 }
 0x9f4   :  { %v2391_v54 = vpack.c.bf16 %v2360_v36, %v2359_v13  ;;  %v3142_v62 = vpop.f32.mrb[76].mxu1 }
 0x9f5   :  { %v2321_v46 = vadd.f32 %v3142_v62, %v2213_v12  ;;  %v2312_v59 = vpop.f32.mrb[77].mxu1 }
 0x9f6   :  { %v2313_v3 = vadd.f32 %v2312_v59, %v2213_v12  ;;  %v3143_v40 = vpop.f32.mrb[78].mxu1  ;;  %3168 = vmatprep.mubr.bf16.mxu0 %v2391_v54 }
 0x9f7   :  { %v2324_v26 = vadd.f32 %v3143_v40, %v2213_v12  ;;  %v2315_v22 = vpop.f32.mrb[79].mxu1  ;;  %3169 = vmatmul.mubr.bf16.vlgmr.msra.gmra.mrb[88].mxu0 %v2392_v1  ;;  %v2365_v61 = vmax.f32 %v2321_v46, 0.0 }
 0x9f8   :  { %v2316_v17 = vadd.f32 %v2315_v22, %v2213_v12  ;;  %v2363_v35 = vmax.f32 %v2313_v3, 0.0 }
 0x9f9   :  { %v2366_v5 = vmax.f32 %v2324_v26, 0.0 }
 0x9fa   :  { %v2364_v44 = vmax.f32 %v2316_v17, 0.0 }
 0x9fb   :  { %v2394_v55 = vpack.c.bf16 %v2366_v5, %v2365_v61 }
 0x9fc   :  { %v2393_v42 = vpack.c.bf16 %v2364_v44, %v2363_v35  ;;  %v3146_v2 = vpop.f32.mrb[80].mxu1 }
 0x9fd   :  { %v2337_v41 = vadd.f32 %v3146_v2, %v2213_v12  ;;  %v2328_v45 = vpop.f32.mrb[81].mxu1 }
 0x9fe   :  { %v2329_v7 = vadd.f32 %v2328_v45, %v2213_v12  ;;  %v3147_v30 = vpop.f32.mrb[82].mxu1  ;;  %3172 = vmatprep.mubr.bf16.mxu0 %v2393_v42 }
 0x9ff   :  { %v2340_v50 = vadd.f32 %v3147_v30, %v2213_v12  ;;  %v2331_v11 = vpop.f32.mrb[83].mxu1  ;;  %3173 = vmatmul.mubr.bf16.gmra.mrb[92].mxu0 %v2394_v55  ;;  %v2369_v23 = vmax.f32 %v2337_v41, 0.0 }
 0xa00   :  { %v2332_v63 = vadd.f32 %v2331_v11, %v2213_v12  ;;  %v2367_v57 = vmax.f32 %v2329_v7, 0.0 }
 0xa01   :  { %v2370_v32 = vmax.f32 %v2340_v50, 0.0 }
 0xa02   :  { %v2368_v4 = vmax.f32 %v2332_v63, 0.0 }
 0xa03   :  { %v2396_v8 = vpack.c.bf16 %v2370_v32, %v2369_v23 }
 0xa04   :  { %v2395_v28 = vpack.c.bf16 %v2368_v4, %v2367_v57  ;;  %v3150_v47 = vpop.f32.mrb[84].mxu1 }
 0xa05   :  { %v2353_v18 = vadd.f32 %v3150_v47, %v2213_v12  ;;  %v2344_v9 = vpop.f32.mrb[85].mxu1 }
 0xa06   :  { %v2345_v31 = vadd.f32 %v2344_v9, %v2213_v12  ;;  %v3151_v60 = vpop.f32.mrb[86].mxu1  ;;  %3176 = vmatprep.mubr.bf16.mxu0 %v2395_v28 }
 0xa07   :  { %v2356_v48 = vadd.f32 %v3151_v60, %v2213_v12  ;;  %v2347_v10 = vpop.f32.mrb[87].mxu1  ;;  %3177 = vmatmul.mubr.bf16.gmra.mrb[96].mxu0 %v2396_v8  ;;  %v2373_v38 = vmax.f32 %v2353_v18, 0.0 }
 0xa08   :  { %v2348_v34 = vadd.f32 %v2347_v10, %v2213_v12  ;;  %v2371_v37 = vmax.f32 %v2345_v31, 0.0 }
 0xa09   :  { %v2374_v58 = vmax.f32 %v2356_v48, 0.0 }
 0xa0a   :  { %v2372_v0 = vmax.f32 %v2348_v34, 0.0 }
 0xa0b   :  { %v2398_v16 = vpack.c.bf16 %v2374_v58, %v2373_v38 }
 0xa0c   :  { %v2397_v6 = vpack.c.bf16 %v2372_v0, %v2371_v37 }
 0xa0e   :  { %3180 = vmatprep.mubr.bf16.mxu0 %v2397_v6 }
 0xa0f   :  { %3181 = vmatmul.mubr.bf16.gmra.mrb[100].mxu0 %v2398_v16 }
 0xaca   :  { %v3170_v53 = vpop.f32.mrb[88].mxu0 }
 0xacb   :  { %v2491_v29 = vadd.f32 %v3170_v53, %v2399_v52  ;;  %v2482_v24 = vpop.f32.mrb[89].mxu0 }
 0xacc   :  { %v2483_v19 = vadd.f32 %v2482_v24, %v2399_v52  ;;  %v3171_v20 = vpop.f32.mrb[90].mxu0 }
 0xacd   :  { %2548 = vst.msk [vmem:[%s3990_s4 + $0x10] sm:$0xff] %vm2545_vm3, %v2491_v29  ;;  %v2494_v39 = vadd.f32 %v3171_v20, %v2399_v52  ;;  %v2485_v12 = vpop.f32.mrb[91].mxu0 }
 0xace   :  { %2546 = vst.msk [vmem:[%s3990_s4] sm:$0xff] %vm2545_vm3, %v2483_v19  ;;  %v2486_v14 = vadd.f32 %v2485_v12, %v2399_v52 }
 0xacf   :  { %2549 = vst.msk [vmem:[%s3990_s4 + $0x18] sm:$0xff] %vm2545_vm3, %v2494_v39 }
 0xad0   :  { %2547 = vst.msk [vmem:[%s3990_s4 + $0x8] sm:$0xff] %vm2545_vm3, %v2486_v14 }
 0xad2   :  { %v3174_v33 = vpop.f32.mrb[92].mxu0 }
 0xad3   :  { %v2507_v43 = vadd.f32 %v3174_v33, %v2399_v52  ;;  %v2498_v15 = vpop.f32.mrb[93].mxu0 }
 0xad4   :  { %v2499_v25 = vadd.f32 %v2498_v15, %v2399_v52  ;;  %v3175_v56 = vpop.f32.mrb[94].mxu0 }
 0xad5   :  { %2552 = vst.msk [vmem:[%s3990_s4 + $0x30] sm:$0xff] %vm2545_vm3, %v2507_v43  ;;  %v2510_v21 = vadd.f32 %v3175_v56, %v2399_v52  ;;  %v2501_v49 = vpop.f32.mrb[95].mxu0 }
 0xad6   :  { %2550 = vst.msk [vmem:[%s3990_s4 + $0x20] sm:$0xff] %vm2545_vm3, %v2499_v25  ;;  %v2502_v51 = vadd.f32 %v2501_v49, %v2399_v52 }
 0xad7   :  { %2553 = vst.msk [vmem:[%s3990_s4 + $0x38] sm:$0xff] %vm2545_vm3, %v2510_v21 }
 0xad8   :  { %2551 = vst.msk [vmem:[%s3990_s4 + $0x28] sm:$0xff] %vm2545_vm3, %v2502_v51 }
 0xada   :  { %v3178_v27 = vpop.f32.mrb[96].mxu0 }
 0xadb   :  { %v2523_v13 = vadd.f32 %v3178_v27, %v2399_v52  ;;  %v2514_v36 = vpop.f32.mrb[97].mxu0 }
 0xadc   :  { %v2515_v1 = vadd.f32 %v2514_v36, %v2399_v52  ;;  %v3179_v54 = vpop.f32.mrb[98].mxu0 }
 0xadd   :  { %2556 = vst.msk [vmem:[%s3990_s4 + $0x50] sm:$0xff] %vm2545_vm3, %v2523_v13  ;;  %v2526_v62 = vadd.f32 %v3179_v54, %v2399_v52  ;;  %v2517_v46 = vpop.f32.mrb[99].mxu0 }
 0xade   :  { %2554 = vst.msk [vmem:[%s3990_s4 + $0x40] sm:$0xff] %vm2545_vm3, %v2515_v1  ;;  %v2518_v59 = vadd.f32 %v2517_v46, %v2399_v52 }
 0xadf   :  { %2557 = vst.msk [vmem:[%s3990_s4 + $0x58] sm:$0xff] %vm2545_vm3, %v2526_v62 }
 0xae0   :  { %2555 = vst.msk [vmem:[%s3990_s4 + $0x48] sm:$0xff] %vm2545_vm3, %v2518_v59 }
 0xae2   :  { %v3182_v3 = vpop.f32.mrb[100].mxu0 }
 0xae3   :  { %v2539_v40 = vadd.f32 %v3182_v3, %v2399_v52  ;;  %v2530_v26 = vpop.f32.mrb[101].mxu0 }
 0xae4   :  { %v2531_v22 = vadd.f32 %v2530_v26, %v2399_v52  ;;  %v3183_v17 = vpop.f32.mrb[102].mxu0 }
 0xae5   :  { %2560 = vst.msk [vmem:[%s3990_s4 + $0x70] sm:$0xff] %vm2545_vm3, %v2539_v40  ;;  %v2542_v61 = vadd.f32 %v3183_v17, %v2399_v52  ;;  %v2533_v5 = vpop.f32.mrb[103].mxu0 }
 0xae6   :  { %2558 = vst.msk [vmem:[%s3990_s4 + $0x60] sm:$0xff] %vm2545_vm3, %v2531_v22  ;;  %v2534_v35 = vadd.f32 %v2533_v5, %v2399_v52 }
 0xae7   :  { %2561 = vst.msk [vmem:[%s3990_s4 + $0x78] sm:$0xff] %vm2545_vm3, %v2542_v61 }
 0xae8   :  { %2559 = vst.msk [vmem:[%s3990_s4 + $0x68] sm:$0xff] %vm2545_vm3, %v2534_v35 }
 0xae9   :  { %2566 = vsyncpa [#allocation3], 1 }

</bundles_post_ra>
